<compile_context>
chip_gen: v7x
topology: tpu7x:2x2x1
jax: 0.10.0
libtpu: 0.0.40
codegen_flags: <defaults>
</compile_context>

<pallas_src>
import functools

import jax
import jax.numpy as jnp
from jax.experimental import pallas as pl
from jax.experimental.pallas import tpu as pltpu

NL = 8  # packed layer slots: fc1, fc2, fc3, (fc31|fc32 fused), fc4, fc5, fc6, fc7


def _leaky_relu(v, slope=0.2):
    return jnp.where(v > 0, v, slope * v)


def _round_up(n, m):
    return ((n + m - 1) // m) * m


def vae_kernel(xin_ref, w_ref, b_ref, out_ref, zbuf_ref, *, x_dim, z_dim):
    # xin_ref: (TB, D) f32 slab, lanes [0:x_dim)=x, [x_dim:x_dim+z_dim)=eps, rest 0.
    # w_ref:   (NL, D, D) bf16 zero-padded weights (in_features x out_features).
    # b_ref:   (NL, 1, D) f32 zero-padded biases.
    slab = xin_ref[...]

    def dense(a, i):
        # bf16 at the MXU inputs, f32 accumulation, f32 bias add.
        return jnp.dot(a.astype(jnp.bfloat16), w_ref[i],
                       preferred_element_type=jnp.float32) + b_ref[i]

    # ----- Encoder: (Linear -> Dropout(eval: identity) -> ReLU) x 3 -----
    # eps lanes of the slab hit zero-padded weight rows, so feeding the raw slab
    # to fc1 is exact.
    h = jnp.maximum(dense(slab, 0), 0.0)   # fc1
    h = jnp.maximum(dense(h, 1), 0.0)      # fc2
    h = jnp.maximum(dense(h, 2), 0.0)      # fc3

    # ----- Fused latent heads (single matmul) -----
    # Columns packed so that mu lands at lanes [x_dim, x_dim+z) and log_var at
    # [x_dim+z, x_dim+2z); all other lanes are exactly zero.
    head = dense(h, 3)
    mu = head[:, x_dim:x_dim + z_dim]
    log_var = head[:, x_dim + z_dim:x_dim + 2 * z_dim]

    # ----- Reparameterization: z = eps * exp(0.5*log_var) + mu -----
    eps = slab[:, x_dim:x_dim + z_dim]
    z = eps * jnp.exp(0.5 * log_var) + mu          # (TB, z_dim), f32

    # Widen z back to the full lane width (zeros beyond z_dim) via a VMEM
    # scratch so decoder matmuls stay full 128-lane MXU ops.
    zbuf_ref[...] = jnp.zeros(zbuf_ref.shape, zbuf_ref.dtype)
    zbuf_ref[:, :z_dim] = z
    z_wide = zbuf_ref[...]

    # ----- Decoder: (Linear -> Dropout(eval: identity) -> LeakyReLU(0.2)) x 4 -----
    d = _leaky_relu(dense(z_wide, 4))    # fc4
    d = _leaky_relu(dense(d, 5))         # fc5
    d = _leaky_relu(dense(d, 6))         # fc6
    recon = _leaky_relu(dense(d, 7))     # fc7 ; exactly zero beyond lane x_dim

    # ----- Lane-dense packed output: [recon | mu | log_var | 0] -----
    # recon is zero on lanes >= x_dim and head is zero on lanes < x_dim and
    # >= x_dim + 2*z_dim, so a single full-width add/store is exact.
    out_ref[...] = recon + head


def pack_params(params, d_pad, x_dim, z_dim):
    """Pack the 9 Linear layers into one (NL, D, D) bf16 weight tensor and one
    (NL, 1, D) f32 bias tensor. Weights are (in_features, out_features).
    Slot 3 fuses the mu / log_var heads, with columns offset so the head output
    lands directly at the packed output lanes [x_dim, x_dim + 2*z_dim)."""
    w_packed = jnp.zeros((NL, d_pad, d_pad), jnp.float32)
    b_packed = jnp.zeros((NL, 1, d_pad), jnp.float32)

    def put(wp, bp, slot, w, b, col_off=0):
        wp = wp.at[slot, :w.shape[0], col_off:col_off + w.shape[1]].set(w)
        bp = bp.at[slot, 0, col_off:col_off + b.shape[0]].set(b)
        return wp, bp

    (w1, b1), (w2, b2), (w3, b3), (w31, b31), (w32, b32), \
        (w4, b4), (w5, b5), (w6, b6), (w7, b7) = params

    w_packed, b_packed = put(w_packed, b_packed, 0, w1, b1)
    w_packed, b_packed = put(w_packed, b_packed, 1, w2, b2)
    w_packed, b_packed = put(w_packed, b_packed, 2, w3, b3)
    w_packed, b_packed = put(w_packed, b_packed, 3, w31, b31, col_off=x_dim)
    w_packed, b_packed = put(w_packed, b_packed, 3, w32, b32,
                             col_off=x_dim + z_dim)
    w_packed, b_packed = put(w_packed, b_packed, 4, w4, b4)
    w_packed, b_packed = put(w_packed, b_packed, 5, w5, b5)
    w_packed, b_packed = put(w_packed, b_packed, 6, w6, b6)
    w_packed, b_packed = put(w_packed, b_packed, 7, w7, b7)
    return w_packed.astype(jnp.bfloat16), b_packed


@functools.partial(jax.jit, static_argnames=("x_dim", "tile_b"))
def vae_forward(x, eps, params, *, x_dim, tile_b=512):
    # Flatten exactly like x.view(-1, x_dim) in PyTorch.
    xf = x.reshape(-1, x_dim).astype(jnp.float32)
    batch = xf.shape[0]
    z_dim = eps.shape[-1]

    feat_dims = [x_dim] + [w.shape[1] for w, _ in params]
    d_pad = _round_up(max(feat_dims + [x_dim + 2 * z_dim]), 128)

    w_packed, b_packed = pack_params(params, d_pad, x_dim, z_dim)

    # Batch tiling: pad the batch so every grid step is a full (tb, D) tile.
    tb = min(tile_b, _round_up(batch, 8))          # tile_b must be a multiple of 8
    b_pad = _round_up(batch, tb)
    slab = jnp.zeros((b_pad, d_pad), jnp.float32)
    slab = slab.at[:batch, :x_dim].set(xf)
    slab = slab.at[:batch, x_dim:x_dim + z_dim].set(eps.astype(jnp.float32))

    grid = (b_pad // tb,)
    kernel = functools.partial(vae_kernel, x_dim=x_dim, z_dim=z_dim)

    out = pl.pallas_call(
        kernel,
        out_shape=jax.ShapeDtypeStruct((b_pad, d_pad), jnp.float32),
        grid=grid,
        in_specs=[
            pl.BlockSpec((tb, d_pad), lambda i: (i, 0)),            # x|eps slab
            pl.BlockSpec((NL, d_pad, d_pad), lambda i: (0, 0, 0)),  # packed weights
            pl.BlockSpec((NL, 1, d_pad), lambda i: (0, 0, 0)),      # packed biases
        ],
        out_specs=pl.BlockSpec((tb, d_pad), lambda i: (i, 0)),
        scratch_shapes=[pltpu.VMEM((tb, d_pad), jnp.float32)],
        compiler_params=pltpu.CompilerParams(
            dimension_semantics=("parallel",)),
    )(slab, w_packed, b_packed)

    recon = out[:batch, :x_dim]
    mu = out[:batch, x_dim:x_dim + z_dim]
    log_var = out[:batch, x_dim + z_dim:x_dim + 2 * z_dim]
    return recon, mu, log_var


def init_linear(key, fan_in, fan_out):
    """Deterministic PyTorch-style uniform(-1/sqrt(fan_in), 1/sqrt(fan_in)) init."""
    kw, kb = jax.random.split(key)
    bound = 1.0 / jnp.sqrt(jnp.float32(fan_in))
    w = jax.random.uniform(kw, (fan_in, fan_out), jnp.float32, -bound, bound)
    b = jax.random.uniform(kb, (fan_out,), jnp.float32, -bound, bound)
    return w, b


def vae_reference(xf, eps, params):
    """Pure-JAX reference with the same bf16-at-the-dot convention."""
    def dense(a, w, b):
        return jnp.dot(a.astype(jnp.bfloat16), w.astype(jnp.bfloat16),
                       preferred_element_type=jnp.float32) + b

    (w1, b1), (w2, b2), (w3, b3), (w31, b31), (w32, b32), \
        (w4, b4), (w5, b5), (w6, b6), (w7, b7) = params
    h = jnp.maximum(dense(xf, w1, b1), 0.0)
    h = jnp.maximum(dense(h, w2, b2), 0.0)
    h = jnp.maximum(dense(h, w3, b3), 0.0)
    mu = dense(h, w31, b31)
    log_var = dense(h, w32, b32)
    z = eps * jnp.exp(0.5 * log_var) + mu
    d = _leaky_relu(dense(z, w4, b4))
    d = _leaky_relu(dense(d, w5, b5))
    d = _leaky_relu(dense(d, w6, b6))
    recon = _leaky_relu(dense(d, w7, b7))
    return recon, mu, log_var


if __name__ == "__main__":
    # x_dim, h_dim1, h_dim2, h_dim3, z_dim consistent with the module.
    x_dim, h_dim1, h_dim2, h_dim3, z_dim = 32, 32, 24, 16, 8
    batch = 300  # deliberately not a multiple of the tile (exercises padding)

    root = jax.random.PRNGKey(0)
    keys = jax.random.split(root, 11)

    # Parameter list in packed-slot order: fc1, fc2, fc3, fc31, fc32, fc4..fc7
    params = [
        init_linear(keys[0], x_dim, h_dim1),    # fc1
        init_linear(keys[1], h_dim1, h_dim2),   # fc2
        init_linear(keys[2], h_dim2, h_dim3),   # fc3
        init_linear(keys[3], h_dim3, z_dim),    # fc31 (mu head)
        init_linear(keys[4], h_dim3, z_dim),    # fc32 (log_var head)
        init_linear(keys[5], z_dim, h_dim3),    # fc4
        init_linear(keys[6], h_dim3, h_dim2),   # fc5
        init_linear(keys[7], h_dim2, h_dim1),   # fc6
        init_linear(keys[8], h_dim1, x_dim),    # fc7
    ]

    x = jax.random.normal(keys[9], (batch, x_dim), jnp.float32)
    eps = jax.random.normal(keys[10], (batch, z_dim), jnp.float32)

    recon, mu, log_var = vae_forward(x, eps, params, x_dim=x_dim, tile_b=128)
    jax.block_until_ready((recon, mu, log_var))

    assert recon.shape == (batch, x_dim)
    assert mu.shape == (batch, z_dim)
    assert log_var.shape == (batch, z_dim)

    r_ref, m_ref, lv_ref = vae_reference(x.reshape(-1, x_dim), eps, params)
    for got, want in ((recon, r_ref), (mu, m_ref), (log_var, lv_ref)):
        max_err = float(jnp.max(jnp.abs(got - want)))
        assert jnp.allclose(got, want, atol=2e-2, rtol=2e-2), max_err

    print("KERNEL_OK")
</pallas_src>

<mosaic_0001>
module attributes {stable_mosaic.version = 11 : i64} {
  func.func @vae_kernel(%arg0: i32, %arg1: memref<128x128xf32, #tpu.memory_space<vmem>>, %arg2: memref<8x128x128xbf16, #tpu.memory_space<vmem>>, %arg3: memref<8x1x128xf32, #tpu.memory_space<vmem>>, %arg4: memref<128x128xf32, #tpu.memory_space<vmem>>, %arg5: memref<128x128xf32, #tpu.memory_space<vmem>>) attributes {dimension_semantics = [#tpu.dimension_semantics<parallel>], iteration_bounds = array<i64: 3>, scalar_prefetch = 0 : i64, scratch_operands = 1 : i64, tpu.core_type = #tpu.core_type<tc>, window_params = [{transform_indices = @transform_0, window_bounds = array<i64: 128, 128>}, {pipeline_mode = #tpu.pipeline_mode<synchronous>, transform_indices = @transform_1, window_bounds = array<i64: 8, 128, 128>}, {pipeline_mode = #tpu.pipeline_mode<synchronous>, transform_indices = @transform_2, window_bounds = array<i64: 8, 1, 128>}, {transform_indices = @transform_3, window_bounds = array<i64: 128, 128>}]} {
    %c0 = arith.constant 0 : index
    %c0_0 = arith.constant 0 : index
    %0 = vector.load %arg1[%c0, %c0_0] : memref<128x128xf32, #tpu.memory_space<vmem>>, vector<128x128xf32>
    %1 = arith.truncf %0 : vector<128x128xf32> to vector<128x128xbf16>
    %c0_1 = arith.constant 0 : index
    %c0_2 = arith.constant 0 : index
    %c0_3 = arith.constant 0 : index
    %2 = vector.load %arg2[%c0_1, %c0_2, %c0_3] : memref<8x128x128xbf16, #tpu.memory_space<vmem>>, vector<1x128x128xbf16>
    %3 = vector.shape_cast %2 : vector<1x128x128xbf16> to vector<128x128xbf16>
    %cst = arith.constant dense<0.000000e+00> : vector<128x128xf32>
    %4 = tpu.matmul %1, %3, %cst {dimension_numbers = #tpu.dot_dimension_numbers<[1], [0], [0], [1], [0, 0, 1, 1], [], []>} : vector<128x128xbf16>, vector<128x128xbf16>, vector<128x128xf32> -> vector<128x128xf32>
    %c0_4 = arith.constant 0 : index
    %c0_5 = arith.constant 0 : index
    %c0_6 = arith.constant 0 : index
    %5 = vector.load %arg3[%c0_4, %c0_5, %c0_6] : memref<8x1x128xf32, #tpu.memory_space<vmem>>, vector<1x1x128xf32>
    %6 = vector.shape_cast %5 : vector<1x1x128xf32> to vector<1x128xf32>
    %7 = vector.broadcast %6 : vector<1x128xf32> to vector<128x128xf32>
    %8 = arith.addf %4, %7 : vector<128x128xf32>
    %cst_7 = arith.constant 0.000000e+00 : f32
    %9 = vector.broadcast %cst_7 : f32 to vector<128x128xf32>
    %10 = arith.maximumf %8, %9 : vector<128x128xf32>
    %11 = arith.truncf %10 : vector<128x128xf32> to vector<128x128xbf16>
    %c1 = arith.constant 1 : index
    %c0_8 = arith.constant 0 : index
    %c0_9 = arith.constant 0 : index
    %12 = vector.load %arg2[%c1, %c0_8, %c0_9] : memref<8x128x128xbf16, #tpu.memory_space<vmem>>, vector<1x128x128xbf16>
    %13 = vector.shape_cast %12 : vector<1x128x128xbf16> to vector<128x128xbf16>
    %cst_10 = arith.constant dense<0.000000e+00> : vector<128x128xf32>
    %14 = tpu.matmul %11, %13, %cst_10 {dimension_numbers = #tpu.dot_dimension_numbers<[1], [0], [0], [1], [0, 0, 1, 1], [], []>} : vector<128x128xbf16>, vector<128x128xbf16>, vector<128x128xf32> -> vector<128x128xf32>
    %c1_11 = arith.constant 1 : index
    %c0_12 = arith.constant 0 : index
    %c0_13 = arith.constant 0 : index
    %15 = vector.load %arg3[%c1_11, %c0_12, %c0_13] : memref<8x1x128xf32, #tpu.memory_space<vmem>>, vector<1x1x128xf32>
    %16 = vector.shape_cast %15 : vector<1x1x128xf32> to vector<1x128xf32>
    %17 = vector.broadcast %16 : vector<1x128xf32> to vector<128x128xf32>
    %18 = arith.addf %14, %17 : vector<128x128xf32>
    %cst_14 = arith.constant 0.000000e+00 : f32
    %19 = vector.broadcast %cst_14 : f32 to vector<128x128xf32>
    %20 = arith.maximumf %18, %19 : vector<128x128xf32>
    %21 = arith.truncf %20 : vector<128x128xf32> to vector<128x128xbf16>
    %c2 = arith.constant 2 : index
    %c0_15 = arith.constant 0 : index
    %c0_16 = arith.constant 0 : index
    %22 = vector.load %arg2[%c2, %c0_15, %c0_16] : memref<8x128x128xbf16, #tpu.memory_space<vmem>>, vector<1x128x128xbf16>
    %23 = vector.shape_cast %22 : vector<1x128x128xbf16> to vector<128x128xbf16>
    %cst_17 = arith.constant dense<0.000000e+00> : vector<128x128xf32>
    %24 = tpu.matmul %21, %23, %cst_17 {dimension_numbers = #tpu.dot_dimension_numbers<[1], [0], [0], [1], [0, 0, 1, 1], [], []>} : vector<128x128xbf16>, vector<128x128xbf16>, vector<128x128xf32> -> vector<128x128xf32>
    %c2_18 = arith.constant 2 : index
    %c0_19 = arith.constant 0 : index
    %c0_20 = arith.constant 0 : index
    %25 = vector.load %arg3[%c2_18, %c0_19, %c0_20] : memref<8x1x128xf32, #tpu.memory_space<vmem>>, vector<1x1x128xf32>
    %26 = vector.shape_cast %25 : vector<1x1x128xf32> to vector<1x128xf32>
    %27 = vector.broadcast %26 : vector<1x128xf32> to vector<128x128xf32>
    %28 = arith.addf %24, %27 : vector<128x128xf32>
    %cst_21 = arith.constant 0.000000e+00 : f32
    %29 = vector.broadcast %cst_21 : f32 to vector<128x128xf32>
    %30 = arith.maximumf %28, %29 : vector<128x128xf32>
    %31 = arith.truncf %30 : vector<128x128xf32> to vector<128x128xbf16>
    %c3 = arith.constant 3 : index
    %c0_22 = arith.constant 0 : index
    %c0_23 = arith.constant 0 : index
    %32 = vector.load %arg2[%c3, %c0_22, %c0_23] : memref<8x128x128xbf16, #tpu.memory_space<vmem>>, vector<1x128x128xbf16>
    %33 = vector.shape_cast %32 : vector<1x128x128xbf16> to vector<128x128xbf16>
    %cst_24 = arith.constant dense<0.000000e+00> : vector<128x128xf32>
    %34 = tpu.matmul %31, %33, %cst_24 {dimension_numbers = #tpu.dot_dimension_numbers<[1], [0], [0], [1], [0, 0, 1, 1], [], []>} : vector<128x128xbf16>, vector<128x128xbf16>, vector<128x128xf32> -> vector<128x128xf32>
    %c3_25 = arith.constant 3 : index
    %c0_26 = arith.constant 0 : index
    %c0_27 = arith.constant 0 : index
    %35 = vector.load %arg3[%c3_25, %c0_26, %c0_27] : memref<8x1x128xf32, #tpu.memory_space<vmem>>, vector<1x1x128xf32>
    %36 = vector.shape_cast %35 : vector<1x1x128xf32> to vector<1x128xf32>
    %37 = vector.broadcast %36 : vector<1x128xf32> to vector<128x128xf32>
    %38 = arith.addf %34, %37 : vector<128x128xf32>
    %39 = vector.extract_strided_slice %38 {offsets = [0, 32], sizes = [128, 8], strides = [1, 1]} : vector<128x128xf32> to vector<128x8xf32>
    %40 = vector.extract_strided_slice %38 {offsets = [0, 40], sizes = [128, 8], strides = [1, 1]} : vector<128x128xf32> to vector<128x8xf32>
    %41 = vector.extract_strided_slice %0 {offsets = [0, 32], sizes = [128, 8], strides = [1, 1]} : vector<128x128xf32> to vector<128x8xf32>
    %cst_28 = arith.constant 5.000000e-01 : f32
    %42 = vector.broadcast %cst_28 : f32 to vector<128x8xf32>
    %43 = arith.mulf %42, %40 : vector<128x8xf32>
    %44 = math.exp %43 : vector<128x8xf32>
    %45 = arith.mulf %41, %44 : vector<128x8xf32>
    %46 = arith.addf %45, %39 : vector<128x8xf32>
    %cst_29 = arith.constant 0.000000e+00 : f32
    %47 = vector.broadcast %cst_29 : f32 to vector<128x128xf32>
    %c0_30 = arith.constant 0 : index
    %c0_31 = arith.constant 0 : index
    %48 = vector.load %arg5[%c0_30, %c0_31] : memref<128x128xf32, #tpu.memory_space<vmem>>, vector<128x128xf32>
    tpu.vector_store %arg5[%c0_30, %c0_31], %47 {strides = array<i32>} : memref<128x128xf32, #tpu.memory_space<vmem>>, vector<128x128xf32>,
    %c0_32 = arith.constant 0 : index
    %c0_33 = arith.constant 0 : index
    %49 = vector.load %arg5[%c0_32, %c0_33] : memref<128x128xf32, #tpu.memory_space<vmem>>, vector<128x8xf32>
    tpu.vector_store %arg5[%c0_32, %c0_33], %46 {strides = array<i32>} : memref<128x128xf32, #tpu.memory_space<vmem>>, vector<128x8xf32>,
    %c0_34 = arith.constant 0 : index
    %c0_35 = arith.constant 0 : index
    %50 = vector.load %arg5[%c0_34, %c0_35] : memref<128x128xf32, #tpu.memory_space<vmem>>, vector<128x128xf32>
    %51 = arith.truncf %50 : vector<128x128xf32> to vector<128x128xbf16>
    %c4 = arith.constant 4 : index
    %c0_36 = arith.constant 0 : index
    %c0_37 = arith.constant 0 : index
    %52 = vector.load %arg2[%c4, %c0_36, %c0_37] : memref<8x128x128xbf16, #tpu.memory_space<vmem>>, vector<1x128x128xbf16>
    %53 = vector.shape_cast %52 : vector<1x128x128xbf16> to vector<128x128xbf16>
    %cst_38 = arith.constant dense<0.000000e+00> : vector<128x128xf32>
    %54 = tpu.matmul %51, %53, %cst_38 {dimension_numbers = #tpu.dot_dimension_numbers<[1], [0], [0], [1], [0, 0, 1, 1], [], []>} : vector<128x128xbf16>, vector<128x128xbf16>, vector<128x128xf32> -> vector<128x128xf32>
    %c4_39 = arith.constant 4 : index
    %c0_40 = arith.constant 0 : index
    %c0_41 = arith.constant 0 : index
    %55 = vector.load %arg3[%c4_39, %c0_40, %c0_41] : memref<8x1x128xf32, #tpu.memory_space<vmem>>, vector<1x1x128xf32>
    %56 = vector.shape_cast %55 : vector<1x1x128xf32> to vector<1x128xf32>
    %57 = vector.broadcast %56 : vector<1x128xf32> to vector<128x128xf32>
    %58 = arith.addf %54, %57 : vector<128x128xf32>
    %cst_42 = arith.constant 0.000000e+00 : f32
    %59 = vector.broadcast %cst_42 : f32 to vector<128x128xf32>
    %60 = arith.cmpf ogt, %58, %59 : vector<128x128xf32>
    %cst_43 = arith.constant 2.000000e-01 : f32
    %61 = vector.broadcast %cst_43 : f32 to vector<128x128xf32>
    %62 = arith.mulf %61, %58 : vector<128x128xf32>
    %63 = arith.select %60, %58, %62 : vector<128x128xi1>, vector<128x128xf32>
    %64 = arith.truncf %63 : vector<128x128xf32> to vector<128x128xbf16>
    %c5 = arith.constant 5 : index
    %c0_44 = arith.constant 0 : index
    %c0_45 = arith.constant 0 : index
    %65 = vector.load %arg2[%c5, %c0_44, %c0_45] : memref<8x128x128xbf16, #tpu.memory_space<vmem>>, vector<1x128x128xbf16>
    %66 = vector.shape_cast %65 : vector<1x128x128xbf16> to vector<128x128xbf16>
    %cst_46 = arith.constant dense<0.000000e+00> : vector<128x128xf32>
    %67 = tpu.matmul %64, %66, %cst_46 {dimension_numbers = #tpu.dot_dimension_numbers<[1], [0], [0], [1], [0, 0, 1, 1], [], []>} : vector<128x128xbf16>, vector<128x128xbf16>, vector<128x128xf32> -> vector<128x128xf32>
    %c5_47 = arith.constant 5 : index
    %c0_48 = arith.constant 0 : index
    %c0_49 = arith.constant 0 : index
    %68 = vector.load %arg3[%c5_47, %c0_48, %c0_49] : memref<8x1x128xf32, #tpu.memory_space<vmem>>, vector<1x1x128xf32>
    %69 = vector.shape_cast %68 : vector<1x1x128xf32> to vector<1x128xf32>
    %70 = vector.broadcast %69 : vector<1x128xf32> to vector<128x128xf32>
    %71 = arith.addf %67, %70 : vector<128x128xf32>
    %cst_50 = arith.constant 0.000000e+00 : f32
    %72 = vector.broadcast %cst_50 : f32 to vector<128x128xf32>
    %73 = arith.cmpf ogt, %71, %72 : vector<128x128xf32>
    %cst_51 = arith.constant 2.000000e-01 : f32
    %74 = vector.broadcast %cst_51 : f32 to vector<128x128xf32>
    %75 = arith.mulf %74, %71 : vector<128x128xf32>
    %76 = arith.select %73, %71, %75 : vector<128x128xi1>, vector<128x128xf32>
    %77 = arith.truncf %76 : vector<128x128xf32> to vector<128x128xbf16>
    %c6 = arith.constant 6 : index
    %c0_52 = arith.constant 0 : index
    %c0_53 = arith.constant 0 : index
    %78 = vector.load %arg2[%c6, %c0_52, %c0_53] : memref<8x128x128xbf16, #tpu.memory_space<vmem>>, vector<1x128x128xbf16>
    %79 = vector.shape_cast %78 : vector<1x128x128xbf16> to vector<128x128xbf16>
    %cst_54 = arith.constant dense<0.000000e+00> : vector<128x128xf32>
    %80 = tpu.matmul %77, %79, %cst_54 {dimension_numbers = #tpu.dot_dimension_numbers<[1], [0], [0], [1], [0, 0, 1, 1], [], []>} : vector<128x128xbf16>, vector<128x128xbf16>, vector<128x128xf32> -> vector<128x128xf32>
    %c6_55 = arith.constant 6 : index
    %c0_56 = arith.constant 0 : index
    %c0_57 = arith.constant 0 : index
    %81 = vector.load %arg3[%c6_55, %c0_56, %c0_57] : memref<8x1x128xf32, #tpu.memory_space<vmem>>, vector<1x1x128xf32>
    %82 = vector.shape_cast %81 : vector<1x1x128xf32> to vector<1x128xf32>
    %83 = vector.broadcast %82 : vector<1x128xf32> to vector<128x128xf32>
    %84 = arith.addf %80, %83 : vector<128x128xf32>
    %cst_58 = arith.constant 0.000000e+00 : f32
    %85 = vector.broadcast %cst_58 : f32 to vector<128x128xf32>
    %86 = arith.cmpf ogt, %84, %85 : vector<128x128xf32>
    %cst_59 = arith.constant 2.000000e-01 : f32
    %87 = vector.broadcast %cst_59 : f32 to vector<128x128xf32>
    %88 = arith.mulf %87, %84 : vector<128x128xf32>
    %89 = arith.select %86, %84, %88 : vector<128x128xi1>, vector<128x128xf32>
    %90 = arith.truncf %89 : vector<128x128xf32> to vector<128x128xbf16>
    %c7 = arith.constant 7 : index
    %c0_60 = arith.constant 0 : index
    %c0_61 = arith.constant 0 : index
    %91 = vector.load %arg2[%c7, %c0_60, %c0_61] : memref<8x128x128xbf16, #tpu.memory_space<vmem>>, vector<1x128x128xbf16>
    %92 = vector.shape_cast %91 : vector<1x128x128xbf16> to vector<128x128xbf16>
    %cst_62 = arith.constant dense<0.000000e+00> : vector<128x128xf32>
    %93 = tpu.matmul %90, %92, %cst_62 {dimension_numbers = #tpu.dot_dimension_numbers<[1], [0], [0], [1], [0, 0, 1, 1], [], []>} : vector<128x128xbf16>, vector<128x128xbf16>, vector<128x128xf32> -> vector<128x128xf32>
    %c7_63 = arith.constant 7 : index
    %c0_64 = arith.constant 0 : index
    %c0_65 = arith.constant 0 : index
    %94 = vector.load %arg3[%c7_63, %c0_64, %c0_65] : memref<8x1x128xf32, #tpu.memory_space<vmem>>, vector<1x1x128xf32>
    %95 = vector.shape_cast %94 : vector<1x1x128xf32> to vector<1x128xf32>
    %96 = vector.broadcast %95 : vector<1x128xf32> to vector<128x128xf32>
    %97 = arith.addf %93, %96 : vector<128x128xf32>
    %cst_66 = arith.constant 0.000000e+00 : f32
    %98 = vector.broadcast %cst_66 : f32 to vector<128x128xf32>
    %99 = arith.cmpf ogt, %97, %98 : vector<128x128xf32>
    %cst_67 = arith.constant 2.000000e-01 : f32
    %100 = vector.broadcast %cst_67 : f32 to vector<128x128xf32>
    %101 = arith.mulf %100, %97 : vector<128x128xf32>
    %102 = arith.select %99, %97, %101 : vector<128x128xi1>, vector<128x128xf32>
    %103 = arith.addf %102, %38 : vector<128x128xf32>
    %c0_68 = arith.constant 0 : index
    %c0_69 = arith.constant 0 : index
    %104 = vector.load %arg4[%c0_68, %c0_69] : memref<128x128xf32, #tpu.memory_space<vmem>>, vector<128x128xf32>
    tpu.vector_store %arg4[%c0_68, %c0_69], %103 {strides = array<i32>} : memref<128x128xf32, #tpu.memory_space<vmem>>, vector<128x128xf32>,
    return
  }
  func.func @transform_0(%arg0: i32) -> (i32, i32) {
    %c0_i32 = arith.constant 0 : i32
    %c0_i32_0 = arith.constant 0 : i32
    return %arg0, %c0_i32 : i32, i32
  }
  func.func @transform_1(%arg0: i32) -> (i32, i32, i32) {
    %c0_i32 = arith.constant 0 : i32
    %c0_i32_0 = arith.constant 0 : i32
    %c0_i32_1 = arith.constant 0 : i32
    %c0_i32_2 = arith.constant 0 : i32
    return %c0_i32, %c0_i32_0, %c0_i32_1 : i32, i32, i32
  }
  func.func @transform_2(%arg0: i32) -> (i32, i32, i32) {
    %c0_i32 = arith.constant 0 : i32
    %c0_i32_0 = arith.constant 0 : i32
    %c0_i32_1 = arith.constant 0 : i32
    %c0_i32_2 = arith.constant 0 : i32
    return %c0_i32, %c0_i32_0, %c0_i32_1 : i32, i32, i32
  }
  func.func @transform_3(%arg0: i32) -> (i32, i32) {
    %c0_i32 = arith.constant 0 : i32
    %c0_i32_0 = arith.constant 0 : i32
    return %arg0, %c0_i32 : i32, i32
  }
}

</mosaic_0001>

<bundles_post_ra>
// kernel: vae_forward.1
= control target key start
LH: loop header
LB: loop body
LE: loop exit
PB: predicated region body
PF: predicated region fallthrough
CT: control target
= control target key end

     0   :  { %s2930_s12 = smov 0   ;;  %s3464_s0 = inlined_call_operand.vmem [shape: f32[384,128], index: 0, kind: input, shape index: {}]   ;;  %s3465_s1 = inlined_call_operand.vmem [shape: bf16[8,128,128], index: 1, kind: input, shape index: {}]   ;;  %s3466_s2 = inlined_call_operand.vmem [shape: f32[8,1,128], index: 2, kind: input, shape index: {}]   ;;  %s3467_s3 = inlined_call_operand.vmem [shape: f32[384,128], index: 3, kind: output, shape index: {}]  }
   0x1 LB: > { %s2198_s13 = sadd.s32 4294967295, %s2905_s12   ;;  %p2202_p0 = scmp.ge.s32.totalorder %s2905_s12, 1  ;;  %s2905_s12 = sphi %s2930_s12, %s13_s12  }
   0x2   : > { %p138_p1 = scmp.lt.s32.totalorder %s2905_s12, 4 }
   0x4   : > { %p139_p2 = pnand %p2202_p0, %p138_p1 }
   0x5   : > { %v2795_v0 = vld [vmem:[%s3465_s1] sm:$0xff] (!%p139_p2)   ;;  %s2203_s16 = sshll.u32 (!%p139_p2), %s2198_s13, 4  ;;  %v2796_v1 = vld [vmem:[%s3465_s1 + $0x8] sm:$0xff] (!%p139_p2)   ;;  %v2797_v2 = vld [vmem:[%s3465_s1 + $0x10] sm:$0xff] (!%p139_p2)   ;;  %s2907_s20 = smov (!%p139_p2), 120   ;;  %vm1173_vm0 = vcmask (!%p139_p2), 64512  }
   0x6   : > { %142 = sbr.rel (%p139_p2) target bundleno = 2102 (0x836), region = 32  ;;  %p163_p3 = scmp.lt.s32.totalorder (!%p139_p2), %s2203_s16, 47  ;;  %2528 = vmatprep.subr.bf16.mxu0 (!%p139_p2), %v2795_v0  ;;  %v2798_v3 = vld [vmem:[%s3465_s1 + $0x18] sm:$0xff] (!%p139_p2)   ;;  %v2799_v7 = vld [vmem:[%s3465_s1 + $0x20] sm:$0xff] (!%p139_p2)   ;;  %v2804_v9 = vld [vmem:[%s3465_s1 + $0x48] sm:$0xff] (!%p139_p2)  }
   0x7   : > { %2529 = vmatpush3.bf16.msra.mxu0 (!%p139_p2), %v2795_v0  ;;  %v2803_v8 = vld [vmem:[%s3465_s1 + $0x40] sm:$0xff] (!%p139_p2)   ;;  %v2800_v10 = vld [vmem:[%s3465_s1 + $0x28] sm:$0xff] (!%p139_p2)   ;;  %v2805_v11 = vld [vmem:[%s3465_s1 + $0x50] sm:$0xff] (!%p139_p2)   ;;  %s2909_s13 = smov (!%p139_p2), 96  }
   0x8   : > { %2530 = vmatprep.subr.bf16.mxu0 (!%p139_p2), %v2796_v1  ;;  %2560 = vmatprep.subr.bf16.mxu1 (!%p139_p2), %v2803_v8  ;;  %v2801_v12 = vld [vmem:[%s3465_s1 + $0x30] sm:$0xff] (!%p139_p2)   ;;  %v2806_v13 = vld [vmem:[%s3465_s1 + $0x58] sm:$0xff] (!%p139_p2)   ;;  %v2807_v15 = vld [vmem:[%s3465_s1 + $0x60] sm:$0xff] (!%p139_p2)  }
   0x9   : > { %2561 = vmatpush3.bf16.msra.mxu1 (!%p139_p2), %v2803_v8  ;;  %v2802_v14 = vld [vmem:[%s3465_s1 + $0x38] sm:$0xff] (!%p139_p2)   ;;  %v2808_v20 = vld [vmem:[%s3465_s1 + $0x68] sm:$0xff] (!%p139_p2)   ;;  %v2809_v38 = vld [vmem:[%s3465_s1 + $0x70] sm:$0xff] (!%p139_p2)  }
   0xa   : > { %2562 = vmatprep.subr.bf16.mxu1 (!%p139_p2), %v2804_v9  ;;  %v2810_v39 = vld [vmem:[%s3465_s1 + $0x78] sm:$0xff] (!%p139_p2)   ;;  %v2811_v40 = vld [vmem:[%s3465_s1 + $0x80] sm:$0xff] (!%p139_p2)   ;;  %v2812_v41 = vld [vmem:[%s3465_s1 + $0x88] sm:$0xff] (!%p139_p2)  }
   0xb   : > { %2531 = vmatpush3.bf16.msra.mxu0 (!%p139_p2), %v2796_v1  ;;  %v2813_v42 = vld [vmem:[%s3465_s1 + $0x90] sm:$0xff] (!%p139_p2)   ;;  %v2814_v43 = vld [vmem:[%s3465_s1 + $0x98] sm:$0xff] (!%p139_p2)   ;;  %v2815_v44 = vld [vmem:[%s3465_s1 + $0xa0] sm:$0xff] (!%p139_p2)  }
   0xc   : > { %2532 = vmatprep.subr.bf16.mxu0 (!%p139_p2), %v2797_v2  ;;  %v2816_v45 = vld [vmem:[%s3465_s1 + $0xa8] sm:$0xff] (!%p139_p2)   ;;  %v2207_v46 = vld [vmem:[%s3466_s2] ss:$0 sm:$0xff] (!%p139_p2) }
   0xd   : > { %s3469_s16 = smov (!%p163_p3, %s2203_s16), 47  ;;  %2563 = vmatpush3.bf16.msra.mxu1 %v2804_v9 }
   0xe   : > { %s2204_s21 = sshll.u32 %s3469_s16, 3  ;;  %2564 = vmatprep.subr.bf16.mxu1 %v2805_v11 }
   0xf   : > { %s2955_s24 = scalar_lea.vmem %s3464_s0, %s2204_s21  ;;  %2533 = vmatpush3.bf16.msra.mxu0 %v2797_v2  ;;  %s3415_s26 = scalar_lea.vmem %s3467_s3, %s2204_s21 }
  0x10   : > { %v175_v4 = vld [vmem:[%s2955_s24] sm:$0xff]  ;;  %v176_v5 = vld [vmem:[%s2955_s24 + $0x8] sm:$0xff]  ;;  %2534 = vmatprep.subr.bf16.mxu0 %v2798_v3  ;;  %v177_v16 = vld [vmem:[%s2955_s24 + $0x10] sm:$0xff] }
  0x11   : > { %v191_v6 = vpack.c.bf16 %v176_v5, %v175_v4  ;;  %v178_v17 = vld [vmem:[%s2955_s24 + $0x18] sm:$0xff]  ;;  %2565 = vmatpush3.bf16.msra.mxu1 %v2805_v11  ;;  %v179_v18 = vld [vmem:[%s2955_s24 + $0x20] sm:$0xff]  ;;  %v180_v19 = vld [vmem:[%s2955_s24 + $0x28] sm:$0xff] }
  0x12   : > { %2566 = vmatprep.subr.bf16.mxu1 %v2806_v13  ;;  %v192_v21 = vpack.c.bf16 %v178_v17, %v177_v16  ;;  %v193_v22 = vpack.c.bf16 %v180_v19, %v179_v18  ;;  %v2997_v23 = vld [vmem:[%s2955_s24 + $0x30] sm:$0xff]  ;;  %v182_v24 = vld [vmem:[%s2955_s24 + $0x38] sm:$0xff]  ;;  %v3001_v25 = vld [vmem:[%s2955_s24 + $0x40] sm:$0xff] }
  0x13   : > { %2544 = vmatprep.mubr.bf16.mxu0 %v191_v6  ;;  %2535 = vmatpush3.bf16.msra.mxu0 %v2798_v3  ;;  %v184_v26 = vld [vmem:[%s2955_s24 + $0x48] sm:$0xff]  ;;  %v194_v27 = vpack.c.bf16 %v182_v24, %v2997_v23  ;;  %v3007_v29 = vld [vmem:[%s2955_s24 + $0x50] sm:$0xff]  ;;  %v3010_v30 = vld [vmem:[%s2955_s24 + $0x58] sm:$0xff] }
  0x14   : > { %2536 = vmatprep.subr.bf16.mxu0 %v2799_v7  ;;  %v195_v28 = vpack.c.bf16 %v184_v26, %v3001_v25  ;;  %v3013_v31 = vld [vmem:[%s2955_s24 + $0x60] sm:$0xff]  ;;  %v3016_v32 = vld [vmem:[%s2955_s24 + $0x68] sm:$0xff]  ;;  %v196_v33 = vpack.c.bf16 %v3010_v30, %v3007_v29  ;;  %v3023_v35 = vld [vmem:[%s2955_s24 + $0x70] sm:$0xff] }
  0x15   : > { %2567 = vmatpush3.bf16.msra.mxu1 %v2806_v13  ;;  %v197_v34 = vpack.c.bf16 %v3016_v32, %v3013_v31  ;;  %v3026_v36 = vld [vmem:[%s2955_s24 + $0x78] sm:$0xff] }
  0x16   : > { %2568 = vmatprep.subr.bf16.mxu1 %v2807_v15  ;;  %v198_v37 = vpack.c.bf16 %v3026_v36, %v3023_v35 }
  0x17   : > { %2537 = vmatpush3.bf16.msra.mxu0 %v2799_v7 }
  0x18   : > { %2538 = vmatprep.subr.bf16.mxu0 %v2800_v10 }
  0x19   : > { %2569 = vmatpush3.bf16.msra.mxu1 %v2807_v15 }
  0x1a   : > { %2570 = vmatprep.subr.bf16.mxu1 %v2808_v20 }
  0x1b   : > { %2539 = vmatpush3.bf16.msra.mxu0 %v2800_v10 }
  0x1c   : > { %2540 = vmatprep.subr.bf16.mxu0 %v2801_v12 }
  0x1d   : > { %2571 = vmatpush3.bf16.msra.mxu1 %v2808_v20 }
  0x1e   : > { %2572 = vmatprep.subr.bf16.mxu1 %v2809_v38 }
  0x1f   : > { %2541 = vmatpush3.bf16.msra.mxu0 %v2801_v12 }
  0x20   : > { %2542 = vmatprep.subr.bf16.mxu0 %v2802_v14 }
  0x21   : > { %2573 = vmatpush3.bf16.msra.mxu1 %v2809_v38 }
  0x22   : > { %2574 = vmatprep.subr.bf16.mxu1 %v2810_v39 }
  0x23   : > { %2543 = vmatpush3.bf16.msra.mxu0 %v2802_v14 }
  0x24   : > { %2592 = vmatprep.subr.bf16.mxu0 %v2811_v40 }
  0x25   : > { %2575 = vmatpush3.bf16.msra.mxu1 %v2810_v39 }
  0x26   : > { %2545 = vmatmul.mubr.bf16.vlgmr.msra.gmra.mrb[0].mxu0 %v192_v21 }
  0x27   : > { %2548 = vmatprep.mubr.bf16.mxu0 %v193_v22  ;;  %2593 = vmatpush3.bf16.msra.mxu0 %v2811_v40 }
  0x28   : > { %2594 = vmatprep.subr.bf16.mxu0 %v2812_v41 }
  0x2b   : > { %2595 = vmatpush3.bf16.msra.mxu0 %v2812_v41 }
  0x2c   : > { %2596 = vmatprep.subr.bf16.mxu0 %v2813_v42 }
  0x2e   : > { %2549 = vmatmul.mubr.bf16.gmra.mrb[4].mxu0 %v194_v27 }
  0x2f   : > { %2552 = vmatprep.mubr.bf16.mxu0 %v195_v28  ;;  %2597 = vmatpush3.bf16.msra.mxu0 %v2813_v42 }
  0x30   : > { %2598 = vmatprep.subr.bf16.mxu0 %v2814_v43 }
  0x33   : > { %2599 = vmatpush3.bf16.msra.mxu0 %v2814_v43 }
  0x34   : > { %2600 = vmatprep.subr.bf16.mxu0 %v2815_v44 }
  0x36   : > { %2553 = vmatmul.mubr.bf16.gmra.mrb[8].mxu0 %v196_v33 }
  0x37   : > { %2556 = vmatprep.mubr.bf16.mxu0 %v197_v34  ;;  %2601 = vmatpush3.bf16.msra.mxu0 %v2815_v44 }
  0x38   : > { %2602 = vmatprep.subr.bf16.mxu0 %v2816_v45 }
  0x3b   : > { %2603 = vmatpush3.bf16.msra.mxu0 %v2816_v45 }
  0x3e   : > { %2557 = vmatmul.mubr.bf16.gmra.mrb[12].mxu0 %v198_v37 }
  0xf9   : > { %v2546_v47 = vpop.f32.mrb[0].mxu0 }
  0xfa   : > { %v313_v48 = vadd.f32 %v2546_v47, %v2207_v46  ;;  %v304_v49 = vpop.f32.mrb[1].mxu0 }
  0xfb   : > { %v305_v50 = vadd.f32 %v2207_v46, %v304_v49  ;;  %v2547_v51 = vpop.f32.mrb[2].mxu0  ;;  %v2818_v49 = vld [vmem:[%s3465_s1 + $0xb8] sm:$0xff]  }
  0xfc   : > { %v316_v52 = vadd.f32 %v2547_v51, %v2207_v46  ;;  %v307_v53 = vpop.f32.mrb[3].mxu0  ;;  %v369_v55 = vmax.f32 %v313_v48, 0.0  ;;  %v2817_v48 = vld [vmem:[%s3465_s1 + $0xb0] sm:$0xff]  }
  0xfd   : > { %v308_v54 = vadd.f32 %v2207_v46, %v307_v53  ;;  %v367_v57 = vmax.f32 %v305_v50, 0.0  ;;  %2604 = vmatprep.subr.bf16.mxu0 %v2817_v48  ;;  %v2820_v50 = vld [vmem:[%s3465_s1 + $0xc8] sm:$0xff]   ;;  %v2821_v51 = vld [vmem:[%s3465_s1 + $0xd0] sm:$0xff]   ;;  %v2823_v53 = vld [vmem:[%s3465_s1 + $0xe0] sm:$0xff]  }
  0xfe   : > { %v370_v56 = vmax.f32 %v316_v52, 0.0  ;;  %2605 = vmatpush3.bf16.msra.mxu0 %v2817_v48  ;;  %v2822_v52 = vld [vmem:[%s3465_s1 + $0xd8] sm:$0xff]  }
  0xff   : > { %v368_v58 = vmax.f32 %v308_v54, 0.0  ;;  %2606 = vmatprep.subr.bf16.mxu0 %v2818_v49  ;;  %v2824_v54 = vld [vmem:[%s3465_s1 + $0xe8] sm:$0xff]  }
 0x100   : > { %v384_v59 = vpack.c.bf16 %v370_v56, %v369_v55  ;;  %v2233_v55 = vld [vmem:[%s3466_s2 + $0x1] ss:$0 sm:$0xff] }
 0x101   : > { %v2550_v60 = vpop.f32.mrb[4].mxu0  ;;  %v383_v61 = vpack.c.bf16 %v368_v58, %v367_v57 }
 0x102   : > { %v329_v62 = vadd.f32 %v2550_v60, %v2207_v46  ;;  %v320_v63 = vpop.f32.mrb[5].mxu0  ;;  %2607 = vmatpush3.bf16.msra.mxu0 %v2818_v49 }
 0x103   : > { %v321_v0 = vadd.f32 %v2207_v46, %v320_v63  ;;  %v2551_v1 = vpop.f32.mrb[6].mxu0  ;;  %2576 = vmatprep.mubr.bf16.mxu1 %v383_v61 }
 0x104   : > { %v373_v2 = vmax.f32 %v329_v62, 0.0  ;;  %v332_v3 = vadd.f32 %v2551_v1, %v2207_v46  ;;  %v323_v4 = vpop.f32.mrb[7].mxu0  ;;  %2577 = vmatmul.mubr.bf16.vlgmr.msra.gmra.mrb[0].mxu1 %v384_v59 }
 0x105   : > { %v371_v5 = vmax.f32 %v321_v0, 0.0  ;;  %v324_v6 = vadd.f32 %v2207_v46, %v323_v4 }
 0x106   : > { %v374_v7 = vmax.f32 %v332_v3, 0.0 }
 0x107   : > { %v372_v8 = vmax.f32 %v324_v6, 0.0 }
 0x108   : > { %v386_v9 = vpack.c.bf16 %v374_v7, %v373_v2 }
 0x109   : > { %v385_v10 = vpack.c.bf16 %v372_v8, %v371_v5  ;;  %v2554_v11 = vpop.f32.mrb[8].mxu0 }
 0x10a   : > { %v345_v12 = vadd.f32 %v2554_v11, %v2207_v46  ;;  %v336_v13 = vpop.f32.mrb[9].mxu0 }
 0x10b   : > { %v337_v14 = vadd.f32 %v2207_v46, %v336_v13  ;;  %v2555_v15 = vpop.f32.mrb[10].mxu0  ;;  %2580 = vmatprep.mubr.bf16.mxu1 %v385_v10 }
 0x10c   : > { %v377_v16 = vmax.f32 %v345_v12, 0.0  ;;  %v348_v17 = vadd.f32 %v2555_v15, %v2207_v46  ;;  %v339_v18 = vpop.f32.mrb[11].mxu0  ;;  %2581 = vmatmul.mubr.bf16.gmra.mrb[4].mxu1 %v386_v9 }
 0x10d   : > { %v375_v19 = vmax.f32 %v337_v14, 0.0  ;;  %v340_v20 = vadd.f32 %v2207_v46, %v339_v18 }
 0x10e   : > { %v378_v21 = vmax.f32 %v348_v17, 0.0 }
 0x10f   : > { %v376_v22 = vmax.f32 %v340_v20, 0.0 }
 0x110   : > { %v388_v24 = vpack.c.bf16 %v378_v21, %v377_v16 }
 0x111   : > { %v387_v26 = vpack.c.bf16 %v376_v22, %v375_v19  ;;  %v2558_v27 = vpop.f32.mrb[12].mxu0 }
 0x112   : > { %v361_v28 = vadd.f32 %v2558_v27, %v2207_v46  ;;  %v352_v33 = vpop.f32.mrb[13].mxu0 }
 0x113   : > { %v353_v34 = vadd.f32 %v2207_v46, %v352_v33  ;;  %v2559_v37 = vpop.f32.mrb[14].mxu0  ;;  %2584 = vmatprep.mubr.bf16.mxu1 %v387_v26 }
 0x114   : > { %v381_v38 = vmax.f32 %v361_v28, 0.0  ;;  %v364_v39 = vadd.f32 %v2559_v37, %v2207_v46  ;;  %v355_v40 = vpop.f32.mrb[15].mxu0  ;;  %2585 = vmatmul.mubr.bf16.gmra.mrb[8].mxu1 %v388_v24 }
 0x115   : > { %v379_v41 = vmax.f32 %v353_v34, 0.0  ;;  %v356_v42 = vadd.f32 %v2207_v46, %v355_v40  ;;  %v2819_v46 = vld [vmem:[%s3465_s1 + $0xc0] sm:$0xff]  }
 0x116   : > { %v382_v43 = vmax.f32 %v364_v39, 0.0  ;;  %2624 = vmatprep.subr.bf16.mxu1 %v2819_v46 }
 0x117   : > { %v380_v44 = vmax.f32 %v356_v42, 0.0  ;;  %2625 = vmatpush3.bf16.msra.mxu1 %v2819_v46 }
 0x118   : > { %v390_v45 = vpack.c.bf16 %v382_v43, %v381_v38  ;;  %2626 = vmatprep.subr.bf16.mxu1 %v2820_v50 }
 0x119   : > { %v389_v47 = vpack.c.bf16 %v380_v44, %v379_v41 }
 0x11b   : > { %2588 = vmatprep.mubr.bf16.mxu1 %v389_v47  ;;  %2627 = vmatpush3.bf16.msra.mxu1 %v2820_v50 }
 0x11c   : > { %2589 = vmatmul.mubr.bf16.gmra.mrb[12].mxu1 %v390_v45  ;;  %2628 = vmatprep.subr.bf16.mxu1 %v2821_v51 }
 0x11f   : > { %2629 = vmatpush3.bf16.msra.mxu1 %v2821_v51 }
 0x120   : > { %2630 = vmatprep.subr.bf16.mxu1 %v2822_v52 }
 0x123   : > { %2631 = vmatpush3.bf16.msra.mxu1 %v2822_v52 }
 0x124   : > { %2632 = vmatprep.subr.bf16.mxu1 %v2823_v53 }
 0x127   : > { %2633 = vmatpush3.bf16.msra.mxu1 %v2823_v53 }
 0x128   : > { %2634 = vmatprep.subr.bf16.mxu1 %v2824_v54 }
 0x12b   : > { %2635 = vmatpush3.bf16.msra.mxu1 %v2824_v54 }
 0x1d7   : > { %v2578_v56 = vpop.f32.mrb[0].mxu1 }
 0x1d8   : > { %v507_v57 = vadd.f32 %v2578_v56, %v2233_v55  ;;  %v498_v58 = vpop.f32.mrb[1].mxu1 }
 0x1d9   : > { %v499_v59 = vadd.f32 %v2233_v55, %v498_v58  ;;  %v2579_v60 = vpop.f32.mrb[2].mxu1  ;;  %v2826_v58 = vld [vmem:[%s3465_s1 + $0xf8] sm:$0xff]  }
 0x1da   : > { %v510_v61 = vadd.f32 %v2579_v60, %v2233_v55  ;;  %v501_v62 = vpop.f32.mrb[3].mxu1  ;;  %v563_v0 = vmax.f32 %v507_v57, 0.0  ;;  %v2825_v57 = vld [vmem:[%s3465_s1 + $0xf0] sm:$0xff]  }
 0x1db   : > { %v502_v63 = vadd.f32 %v2233_v55, %v501_v62  ;;  %v561_v2 = vmax.f32 %v499_v59, 0.0  ;;  %2636 = vmatprep.subr.bf16.mxu1 %v2825_v57 }
 0x1dc   : > { %v564_v1 = vmax.f32 %v510_v61, 0.0  ;;  %2637 = vmatpush3.bf16.msra.mxu1 %v2825_v57 }
 0x1dd   : > { %v562_v3 = vmax.f32 %v502_v63, 0.0  ;;  %2638 = vmatprep.subr.bf16.mxu1 %v2826_v58 }
 0x1de   : > { %v578_v4 = vpack.c.bf16 %v564_v1, %v563_v0 }
 0x1df   : > { %v577_v5 = vpack.c.bf16 %v562_v3, %v561_v2  ;;  %v2582_v6 = vpop.f32.mrb[4].mxu1 }
 0x1e0   : > { %v523_v7 = vadd.f32 %v2582_v6, %v2233_v55  ;;  %v514_v8 = vpop.f32.mrb[5].mxu1  ;;  %2639 = vmatpush3.bf16.msra.mxu1 %v2826_v58 }
 0x1e1   : > { %v515_v9 = vadd.f32 %v2233_v55, %v514_v8  ;;  %v2583_v10 = vpop.f32.mrb[6].mxu1  ;;  %2608 = vmatprep.mubr.bf16.mxu0 %v577_v5 }
 0x1e2   : > { %v526_v11 = vadd.f32 %v2583_v10, %v2233_v55  ;;  %v517_v12 = vpop.f32.mrb[7].mxu1  ;;  %2609 = vmatmul.mubr.bf16.vlgmr.msra.gmra.mrb[16].mxu0 %v578_v4  ;;  %v567_v14 = vmax.f32 %v523_v7, 0.0 }
 0x1e3   : > { %v518_v13 = vadd.f32 %v2233_v55, %v517_v12  ;;  %v565_v16 = vmax.f32 %v515_v9, 0.0 }
 0x1e4   : > { %v568_v15 = vmax.f32 %v526_v11, 0.0 }
 0x1e5   : > { %v566_v17 = vmax.f32 %v518_v13, 0.0 }
 0x1e6   : > { %v580_v18 = vpack.c.bf16 %v568_v15, %v567_v14 }
 0x1e7   : > { %v579_v19 = vpack.c.bf16 %v566_v17, %v565_v16  ;;  %v2586_v20 = vpop.f32.mrb[8].mxu1 }
 0x1e8   : > { %v539_v21 = vadd.f32 %v2586_v20, %v2233_v55  ;;  %v530_v22 = vpop.f32.mrb[9].mxu1 }
 0x1e9   : > { %v531_v24 = vadd.f32 %v2233_v55, %v530_v22  ;;  %v2587_v26 = vpop.f32.mrb[10].mxu1  ;;  %2612 = vmatprep.mubr.bf16.mxu0 %v579_v19 }
 0x1ea   : > { %v542_v27 = vadd.f32 %v2587_v26, %v2233_v55  ;;  %v533_v28 = vpop.f32.mrb[11].mxu1  ;;  %2613 = vmatmul.mubr.bf16.gmra.mrb[20].mxu0 %v580_v18  ;;  %v571_v34 = vmax.f32 %v539_v21, 0.0 }
 0x1eb   : > { %v534_v33 = vadd.f32 %v2233_v55, %v533_v28  ;;  %v569_v38 = vmax.f32 %v531_v24, 0.0 }
 0x1ec   : > { %v572_v37 = vmax.f32 %v542_v27, 0.0 }
 0x1ed   : > { %v570_v39 = vmax.f32 %v534_v33, 0.0 }
 0x1ee   : > { %v582_v40 = vpack.c.bf16 %v572_v37, %v571_v34 }
 0x1ef   : > { %v581_v41 = vpack.c.bf16 %v570_v39, %v569_v38  ;;  %v2590_v42 = vpop.f32.mrb[12].mxu1 }
 0x1f0   : > { %v555_v43 = vadd.f32 %v2590_v42, %v2233_v55  ;;  %v546_v44 = vpop.f32.mrb[13].mxu1 }
 0x1f1   : > { %v547_v45 = vadd.f32 %v2233_v55, %v546_v44  ;;  %v2591_v47 = vpop.f32.mrb[14].mxu1  ;;  %2616 = vmatprep.mubr.bf16.mxu0 %v581_v41 }
 0x1f2   : > { %v558_v48 = vadd.f32 %v2591_v47, %v2233_v55  ;;  %v549_v49 = vpop.f32.mrb[15].mxu1  ;;  %2617 = vmatmul.mubr.bf16.gmra.mrb[24].mxu0 %v582_v40  ;;  %v575_v50 = vmax.f32 %v555_v43, 0.0 }
 0x1f3   : > { %v550_v46 = vadd.f32 %v2233_v55, %v549_v49  ;;  %v573_v52 = vmax.f32 %v547_v45, 0.0  ;;  %v2259_v55 = vld [vmem:[%s3466_s2 + $0x2] ss:$0 sm:$0xff] }
 0x1f4   : > { %v576_v51 = vmax.f32 %v558_v48, 0.0 }
 0x1f5   : > { %v574_v53 = vmax.f32 %v550_v46, 0.0 }
 0x1f6   : > { %v584_v54 = vpack.c.bf16 %v576_v51, %v575_v50 }
 0x1f7   : > { %v583_v56 = vpack.c.bf16 %v574_v53, %v573_v52 }
 0x1f9   : > { %2620 = vmatprep.mubr.bf16.mxu0 %v583_v56 }
 0x1fa   : > { %2621 = vmatmul.mubr.bf16.gmra.mrb[28].mxu0 %v584_v54 }
 0x2b5   : > { %v2610_v59 = vpop.f32.mrb[16].mxu0 }
 0x2b6   : > { %v701_v60 = vadd.f32 %v2610_v59, %v2259_v55  ;;  %v692_v61 = vpop.f32.mrb[17].mxu0 }
 0x2b7   : > { %v693_v62 = vadd.f32 %v2259_v55, %v692_v61  ;;  %v2611_v63 = vpop.f32.mrb[18].mxu0 }
 0x2b8   : > { %v704_v0 = vadd.f32 %v2611_v63, %v2259_v55  ;;  %v695_v1 = vpop.f32.mrb[19].mxu0  ;;  %v757_v3 = vmax.f32 %v701_v60, 0.0  ;;  %v3096_v60 = vld [vmem:[%s3466_s2 + $0x3] ss:$0 sm:$0xff] }
 0x2b9   : > { %v696_v2 = vadd.f32 %v2259_v55, %v695_v1  ;;  %v755_v5 = vmax.f32 %v693_v62, 0.0 }
 0x2ba   : > { %v758_v4 = vmax.f32 %v704_v0, 0.0 }
 0x2bb   : > { %v756_v6 = vmax.f32 %v696_v2, 0.0 }
 0x2bc   : > { %v772_v7 = vpack.c.bf16 %v758_v4, %v757_v3 }
 0x2bd   : > { %v771_v8 = vpack.c.bf16 %v756_v6, %v755_v5  ;;  %v2614_v9 = vpop.f32.mrb[20].mxu0 }
 0x2be   : > { %v717_v10 = vadd.f32 %v2614_v9, %v2259_v55  ;;  %v708_v11 = vpop.f32.mrb[21].mxu0 }
 0x2bf   : > { %v709_v12 = vadd.f32 %v2259_v55, %v708_v11  ;;  %v2615_v13 = vpop.f32.mrb[22].mxu0  ;;  %2640 = vmatprep.mubr.bf16.mxu1 %v771_v8 }
 0x2c0   : > { %v720_v14 = vadd.f32 %v2615_v13, %v2259_v55  ;;  %v711_v15 = vpop.f32.mrb[23].mxu0  ;;  %2641 = vmatmul.mubr.bf16.vlgmr.msra.gmra.mrb[16].mxu1 %v772_v7  ;;  %v761_v17 = vmax.f32 %v717_v10, 0.0 }
 0x2c1   : > { %v712_v16 = vadd.f32 %v2259_v55, %v711_v15  ;;  %v759_v19 = vmax.f32 %v709_v12, 0.0 }
 0x2c2   : > { %v762_v18 = vmax.f32 %v720_v14, 0.0 }
 0x2c3   : > { %v760_v20 = vmax.f32 %v712_v16, 0.0 }
 0x2c4   : > { %v774_v21 = vpack.c.bf16 %v762_v18, %v761_v17 }
 0x2c5   : > { %v773_v22 = vpack.c.bf16 %v760_v20, %v759_v19  ;;  %v2618_v24 = vpop.f32.mrb[24].mxu0 }
 0x2c6   : > { %v733_v26 = vadd.f32 %v2618_v24, %v2259_v55  ;;  %v724_v27 = vpop.f32.mrb[25].mxu0 }
 0x2c7   : > { %v725_v28 = vadd.f32 %v2259_v55, %v724_v27  ;;  %v2619_v33 = vpop.f32.mrb[26].mxu0  ;;  %2644 = vmatprep.mubr.bf16.mxu1 %v773_v22 }
 0x2c8   : > { %v736_v34 = vadd.f32 %v2619_v33, %v2259_v55  ;;  %v727_v37 = vpop.f32.mrb[27].mxu0  ;;  %2645 = vmatmul.mubr.bf16.gmra.mrb[20].mxu1 %v774_v21  ;;  %v765_v39 = vmax.f32 %v733_v26, 0.0 }
 0x2c9   : > { %v728_v38 = vadd.f32 %v2259_v55, %v727_v37  ;;  %v763_v41 = vmax.f32 %v725_v28, 0.0 }
 0x2ca   : > { %v766_v40 = vmax.f32 %v736_v34, 0.0 }
 0x2cb   : > { %v764_v42 = vmax.f32 %v728_v38, 0.0 }
 0x2cc   : > { %v776_v43 = vpack.c.bf16 %v766_v40, %v765_v39 }
 0x2cd   : > { %v775_v44 = vpack.c.bf16 %v764_v42, %v763_v41  ;;  %v2622_v45 = vpop.f32.mrb[28].mxu0 }
 0x2ce   : > { %v749_v47 = vadd.f32 %v2622_v45, %v2259_v55  ;;  %v740_v48 = vpop.f32.mrb[29].mxu0 }
 0x2cf   : > { %v741_v49 = vadd.f32 %v2259_v55, %v740_v48  ;;  %v2623_v46 = vpop.f32.mrb[30].mxu0  ;;  %2648 = vmatprep.mubr.bf16.mxu1 %v775_v44 }
 0x2d0   : > { %v752_v50 = vadd.f32 %v2623_v46, %v2259_v55  ;;  %v743_v51 = vpop.f32.mrb[31].mxu0  ;;  %2649 = vmatmul.mubr.bf16.gmra.mrb[24].mxu1 %v776_v43  ;;  %v769_v53 = vmax.f32 %v749_v47, 0.0 }
 0x2d1   : > { %v744_v52 = vadd.f32 %v2259_v55, %v743_v51  ;;  %v767_v56 = vmax.f32 %v741_v49, 0.0 }
 0x2d2   : > { %v770_v54 = vmax.f32 %v752_v50, 0.0 }
 0x2d3   : > { %v768_v57 = vmax.f32 %v744_v52, 0.0 }
 0x2d4   : > { %v778_v58 = vpack.c.bf16 %v770_v54, %v769_v53 }
 0x2d5   : > { %v777_v59 = vpack.c.bf16 %v768_v57, %v767_v56 }
 0x2d7   : > { %2652 = vmatprep.mubr.bf16.mxu1 %v777_v59 }
 0x2d8   : > { %2653 = vmatmul.mubr.bf16.gmra.mrb[28].mxu1 %v778_v58 }
 0x393   : > { %v2642_v61 = vpop.f32.mrb[16].mxu1 }
 0x394   : > { %v3099_v62 = vadd.f32 %v2642_v61, %v3096_v60  ;;  %v886_v63 = vpop.f32.mrb[17].mxu1 }
 0x395   : > { %v3102_v55 = vadd.f32 %v3096_v60, %v886_v63  ;;  %v2643_v0 = vpop.f32.mrb[18].mxu1 }
 0x396   : > { %v951_v1 = vmul.f32 0.5, %v3099_v62  ;;  %v3106_v2 = vadd.f32 %v2643_v0, %v3096_v60  ;;  %v889_v3 = vpop.f32.mrb[19].mxu1 }
 0x397   : > { %v949_v4 = vmul.f32 0.5, %v3102_v55  ;;  %v3110_v5 = vadd.f32 %v3096_v60, %v889_v3 }
 0x398   : > { %v969_v6 = vmul.f32 1.442695, %v951_v1  ;;  %v952_v7 = vmul.f32 0.5, %v3106_v2 }
 0x399   : > { %v965_v8 = vmul.f32 1.442695, %v949_v4  ;;  %v950_v9 = vmul.f32 0.5, %v3110_v5 }
 0x39a   : > { %2859 = vpow2.f32 %v969_v6  ;;  %v971_v10 = vmul.f32 1.442695, %v952_v7 }
 0x39b   : > { %2861 = vpow2.f32 %v965_v8  ;;  %v967_v11 = vmul.f32 1.442695, %v950_v9  ;;  %v2646_v12 = vpop.f32.mrb[20].mxu1 }
 0x39c   : > { %v3115_v13 = vadd.f32 %v2646_v12, %v3096_v60  ;;  %v902_v14 = vpop.f32.mrb[21].mxu1  ;;  %2863 = vpow2.f32 %v971_v10 }
 0x39d   : > { %v3118_v15 = vadd.f32 %v3096_v60, %v902_v14  ;;  %v2647_v16 = vpop.f32.mrb[22].mxu1  ;;  %2865 = vpow2.f32 %v967_v11 }
 0x39e   : > { %v3121_v17 = vadd.f32 %v2647_v16, %v3096_v60  ;;  %v905_v18 = vpop.f32.mrb[23].mxu1  ;;  %v955_v19 = vmul.f32 0.5, %v3115_v13 }
 0x39f   : > { %v953_v20 = vmul.f32 0.5, %v3118_v15  ;;  %v3126_v21 = vadd.f32 %v3096_v60, %v905_v18 }
 0x3a0   : > { %v956_v24 = vmul.f32 0.5, %v3121_v17  ;;  %v977_v27 = vmul.f32 1.442695, %v955_v19 }
 0x3a1   : > { %v973_v22 = vmul.f32 1.442695, %v953_v20  ;;  %v954_v26 = vmul.f32 0.5, %v3126_v21 }
 0x3a2   : > { %v979_v40 = vmul.f32 1.442695, %v956_v24 }
 0x3a3   : > { %2867 = vpow2.f32 %v973_v22  ;;  %v975_v28 = vmul.f32 1.442695, %v954_v26  ;;  %v2650_v33 = vpop.f32.mrb[24].mxu1 }
 0x3a4   : > { %v2860_v34 = vpop.eup %2859  ;;  %v3131_v37 = vadd.f32 %v2650_v33, %v3096_v60  ;;  %v918_v38 = vpop.f32.mrb[25].mxu1  ;;  %v2908_v33 = vmov 0.0  }
 0x3a5   : > { %v2862_v39 = vpop.eup %2861  ;;  %2869 = vpow2.f32 %v975_v28  ;;  %v3134_v41 = vadd.f32 %v3096_v60, %v918_v38  ;;  %1017 = vrot.lane.b32.xlu1 %v2860_v34, %s2907_s20  ;;  %v2651_v42 = vpop.f32.mrb[26].mxu1  ;;  %v2828_v28 = vld [vmem:[%s3465_s1 + $0x108] sm:$0xff]   ;;  %1093 = vst [vmem:[#allocation2] sm:$0xff] %v2908_v33  ;;  %1094 = vst [vmem:[#allocation2 + $0x8] sm:$0xff] %v2908_v33 }
 0x3a6   : > { %v3138_v43 = vadd.f32 %v2651_v42, %v3096_v60  ;;  %v921_v44 = vpop.f32.mrb[27].mxu1  ;;  %1013 = vrot.lane.b32.xlu0 %v2862_v39, %s2907_s20  ;;  %2871 = vpow2.f32 %v977_v27  ;;  %v959_v45 = vmul.f32 0.5, %v3131_v37  ;;  %v2864_v49 = vpop.eup %2863  ;;  %v2827_v27 = vld [vmem:[%s3465_s1 + $0x100] sm:$0xff]   ;;  %1095 = vst [vmem:[#allocation2 + $0x10] sm:$0xff] %v2908_v33  ;;  %1096 = vst [vmem:[#allocation2 + $0x18] sm:$0xff] %v2908_v33  ;;  %v2829_v39 = vld [vmem:[%s3465_s1 + $0x110] sm:$0xff]  }
 0x3a7   : > { %v957_v47 = vmul.f32 0.5, %v3134_v41  ;;  %v3144_v48 = vadd.f32 %v3096_v60, %v921_v44  ;;  %v2866_v46 = vpop.eup %2865  ;;  %2873 = vpow2.f32 %v979_v40  ;;  %1097 = vst [vmem:[#allocation2 + $0x20] sm:$0xff] %v2908_v33  ;;  %1098 = vst [vmem:[#allocation2 + $0x28] sm:$0xff] %v2908_v33  ;;  %2656 = vmatprep.subr.bf16.mxu0 %v2827_v27  ;;  %v2830_v42 = vld [vmem:[%s3465_s1 + $0x118] sm:$0xff]   ;;  %v2831_v44 = vld [vmem:[%s3465_s1 + $0x120] sm:$0xff]  }
 0x3a8   : > { %v960_v51 = vmul.f32 0.5, %v3138_v43  ;;  %v985_v53 = vmul.f32 1.442695, %v959_v45  ;;  %1099 = vst [vmem:[#allocation2 + $0x30] sm:$0xff] %v2908_v33  ;;  %1100 = vst [vmem:[#allocation2 + $0x38] sm:$0xff] %v2908_v33  ;;  %2657 = vmatpush3.bf16.msra.mxu0 %v2827_v27  ;;  %v2832_v45 = vld [vmem:[%s3465_s1 + $0x128] sm:$0xff]  }
 0x3a9   : > { %v981_v50 = vmul.f32 1.442695, %v957_v47  ;;  %v958_v52 = vmul.f32 0.5, %v3144_v48  ;;  %1019 = vrot.lane.b32.xlu1 %v2864_v49, %s2907_s20  ;;  %1101 = vst [vmem:[#allocation2 + $0x40] sm:$0xff] %v2908_v33  ;;  %1102 = vst [vmem:[#allocation2 + $0x48] sm:$0xff] %v2908_v33  ;;  %2658 = vmatprep.subr.bf16.mxu0 %v2828_v28  ;;  %v2897_v27 = vld [vmem:[%s2955_s24 + $0x38] sm:$0xff] }
 0x3aa   : > { %1015 = vrot.lane.b32.xlu0 %v2866_v46, %s2907_s20  ;;  %v987_v61 = vmul.f32 1.442695, %v960_v51  ;;  %1103 = vst [vmem:[#allocation2 + $0x50] sm:$0xff] %v2908_v33  ;;  %1104 = vst [vmem:[#allocation2 + $0x58] sm:$0xff] %v2908_v33  ;;  %v2833_v46 = vld [vmem:[%s3465_s1 + $0x130] sm:$0xff]  }
 0x3ab   : > { %2875 = vpow2.f32 %v981_v50  ;;  %v983_v54 = vmul.f32 1.442695, %v958_v52  ;;  %v2654_v56 = vpop.f32.mrb[28].mxu1  ;;  %1105 = vst [vmem:[#allocation2 + $0x60] sm:$0xff] %v2908_v33  ;;  %1106 = vst [vmem:[#allocation2 + $0x68] sm:$0xff] %v2908_v33  ;;  %v2891_v50 = vld [vmem:[%s2955_s24] sm:$0xff] }
 0x3ac   : > { %v3151_v57 = vadd.f32 %v2654_v56, %v3096_v60  ;;  %v934_v58 = vpop.f32.mrb[29].mxu1  ;;  %1107 = vst [vmem:[#allocation2 + $0x70] sm:$0xff] %v2908_v33  ;;  %1108 = vst [vmem:[#allocation2 + $0x78] sm:$0xff] %v2908_v33  ;;  %2659 = vmatpush3.bf16.msra.mxu0 %v2828_v28  ;;  %v2892_v52 = vld [vmem:[%s2955_s24 + $0x10] sm:$0xff] }
 0x3ad   : > { %v2868_v59 = vpop.eup %2867  ;;  %2877 = vpow2.f32 %v983_v54  ;;  %v3154_v63 = vadd.f32 %v3096_v60, %v934_v58  ;;  %v2655_v0 = vpop.f32.mrb[30].mxu1  ;;  %2660 = vmatprep.subr.bf16.mxu0 %v2829_v39 }
 0x3ae   : > { %v3157_v1 = vadd.f32 %v2655_v0, %v3096_v60  ;;  %v937_v3 = vpop.f32.mrb[31].mxu1  ;;  %1021 = vrot.lane.b32.xlu0 %v2868_v59, %s2907_s20  ;;  %2879 = vpow2.f32 %v985_v53  ;;  %v963_v6 = vmul.f32 0.5, %v3151_v57  ;;  %v2834_v59 = vld [vmem:[%s3465_s1 + $0x138] sm:$0xff]  }
 0x3af   : > { %v2870_v4 = vpop.eup %2869  ;;  %v961_v7 = vmul.f32 0.5, %v3154_v63  ;;  %v3163_v8 = vadd.f32 %v3096_v60, %v937_v3  ;;  %2881 = vpow2.f32 %v987_v61  ;;  %v2893_v61 = vld [vmem:[%s2955_s24 + $0x8] sm:$0xff] }
 0x3b0   : > { %1023 = vrot.lane.b32.xlu1 %v2870_v4, %s2907_s20  ;;  %v2872_v9 = vpop.eup %2871  ;;  %v964_v11 = vmul.f32 0.5, %v3157_v1  ;;  %v993_v16 = vmul.f32 1.442695, %v963_v6  ;;  %2661 = vmatpush3.bf16.msra.mxu0 %v2829_v39  ;;  %v2894_v4 = vld [vmem:[%s2955_s24 + $0x18] sm:$0xff] }
 0x3b1   : > { %v989_v10 = vmul.f32 1.442695, %v961_v7  ;;  %v962_v12 = vmul.f32 0.5, %v3163_v8  ;;  %v2874_v14 = vpop.eup %2873  ;;  %2662 = vmatprep.subr.bf16.mxu0 %v2830_v42 }
 0x3b2   : > { %1025 = vrot.lane.b32.xlu0 %v2872_v9, %s2907_s20  ;;  %v995_v60 = vmul.f32 1.442695, %v964_v11 }
 0x3b3   : > { %2883 = vpow2.f32 %v989_v10  ;;  %v991_v18 = vmul.f32 1.442695, %v962_v12  ;;  %v2895_v10 = vld [vmem:[%s2955_s24 + $0x20] sm:$0xff] }
 0x3b4   : > { %1027 = vrot.lane.b32.xlu1 %v2874_v14, %s2907_s20  ;;  %2663 = vmatpush3.bf16.msra.mxu0 %v2830_v42 }
 0x3b5   : > { %v2876_v19 = vpop.eup %2875  ;;  %2885 = vpow2.f32 %v991_v18  ;;  %2664 = vmatprep.subr.bf16.mxu0 %v2831_v44  ;;  %v2896_v18 = vld [vmem:[%s2955_s24 + $0x28] sm:$0xff] }
 0x3b6   : > { %1029 = vrot.lane.b32.xlu0 %v2876_v19, %s2907_s20  ;;  %2887 = vpow2.f32 %v993_v16 }
 0x3b7   : > { %v2878_v20 = vpop.eup %2877  ;;  %2889 = vpow2.f32 %v995_v60 }
 0x3b8   : > { %1031 = vrot.lane.b32.xlu1 %v2878_v20, %s2907_s20  ;;  %v2880_v22 = vpop.eup %2879  ;;  %2665 = vmatpush3.bf16.msra.mxu0 %v2831_v44 }
 0x3b9   : > { %v2882_v24 = vpop.eup %2881  ;;  %2666 = vmatprep.subr.bf16.mxu0 %v2832_v45 }
 0x3ba   : > { %1033 = vrot.lane.b32.xlu0 %v2880_v22, %s2907_s20 }
 0x3bc   : > { %1035 = vrot.lane.b32.xlu1 %v2882_v24, %s2907_s20  ;;  %2667 = vmatpush3.bf16.msra.mxu0 %v2832_v45 }
 0x3bd   : > { %v2884_v26 = vpop.eup %2883  ;;  %2668 = vmatprep.subr.bf16.mxu0 %v2833_v46 }
 0x3be   : > { %1037 = vrot.lane.b32.xlu0 %v2884_v26, %s2907_s20 }
 0x3bf   : > { %v2886_v34 = vpop.eup %2885 }
 0x3c0   : > { %1039 = vrot.lane.b32.xlu1 %v2886_v34, %s2907_s20  ;;  %v2888_v38 = vpop.eup %2887  ;;  %2669 = vmatpush3.bf16.msra.mxu0 %v2833_v46 }
 0x3c1   : > { %v2890_v40 = vpop.eup %2889  ;;  %2670 = vmatprep.subr.bf16.mxu0 %v2834_v59 }
 0x3c2   : > { %1041 = vrot.lane.b32.xlu0 %v2888_v38, %s2907_s20 }
 0x3c4   : > { %1043 = vrot.lane.b32.xlu1 %v2890_v40, %s2907_s20  ;;  %2671 = vmatpush3.bf16.msra.mxu0 %v2834_v59  ;;  %v2898_v40 = vld [vmem:[%s2955_s24 + $0x48] sm:$0xff] }
 0x417   : > { %v1018_v47 = vpop.permute.xlu1 %1017 }
 0x418   : > { %v1014_v49 = vpop.permute.xlu0 %1013  ;;  %v1063_v53 = vmul.f32 %v2892_v52, %v1018_v47 }
 0x419   : > { %v1061_v51 = vmul.f32 %v2891_v50, %v1014_v49 }
 0x41a   : > { %v1079_v3 = vadd.f32 %v1063_v53, %v3099_v62 }
 0x41b   : > { %v1077_v54 = vadd.f32 %v1061_v51, %v3102_v55  ;;  %v1020_v56 = vpop.permute.xlu1 %1019 }
 0x41c   : > { %v1016_v58 = vpop.permute.xlu0 %1015  ;;  %v1064_v6 = vmul.f32 %v2894_v4, %v1020_v56  ;;  %v2839_v4 = vld [vmem:[%s3465_s1 + $0x160] sm:$0xff]  }
 0x41d   : > { %v1062_v0 = vmul.f32 %v2893_v61, %v1016_v58  ;;  %1125 = vrot.lane.b32.xlu0 %v1077_v54, %s2909_s13 }
 0x41e   : > { %v1080_v14 = vadd.f32 %v1064_v6, %v3106_v2  ;;  %v2840_v6 = vld [vmem:[%s3465_s1 + $0x168] sm:$0xff]  }
 0x41f   : > { %v1078_v7 = vadd.f32 %v1062_v0, %v3110_v5 }
 0x420   : > { %v1022_v9 = vpop.permute.xlu0 %1021 }
 0x421   : > { %v1065_v11 = vmul.f32 %v2895_v10, %v1022_v9  ;;  %1129 = vrot.lane.b32.xlu0 %v1079_v3, %s2909_s13  ;;  %1127 = vrot.lane.b32.xlu1 %v1078_v7, %s2909_s13  ;;  %v2838_v3 = vld [vmem:[%s3465_s1 + $0x158] sm:$0xff]  }
 0x422   : > { %v1024_v12 = vpop.permute.xlu1 %1023 }
 0x423   : > { %v1081_v16 = vadd.f32 %v1065_v11, %v3118_v15  ;;  %v1066_v19 = vmul.f32 %v2896_v18, %v1024_v12 }
 0x424   : > { %v1026_v60 = vpop.permute.xlu0 %1025 }
 0x425   : > { %v1067_v20 = vmul.f32 %v1026_v60, %v2997_v23  ;;  %1131 = vrot.lane.b32.xlu1 %v1080_v14, %s2909_s13  ;;  %1133 = vrot.lane.b32.xlu0 %v1081_v16, %s2909_s13  ;;  %v1082_v24 = vadd.f32 %v1066_v19, %v3126_v21 }
 0x426   : > { %v1028_v22 = vpop.permute.xlu1 %1027 }
 0x427   : > { %v1083_v26 = vadd.f32 %v1067_v20, %v3115_v13  ;;  %v1068_v28 = vmul.f32 %v2897_v27, %v1028_v22 }
 0x428   : > { %v1030_v33 = vpop.permute.xlu0 %1029 }
 0x429   : > { %v1069_v34 = vmul.f32 %v1030_v33, %v3001_v25  ;;  %1135 = vrot.lane.b32.xlu1 %v1082_v24, %s2909_s13  ;;  %1137 = vrot.lane.b32.xlu0 %v1083_v26, %s2909_s13  ;;  %v1084_v23 = vadd.f32 %v1068_v28, %v3121_v17 }
 0x42a   : > { %v1032_v38 = vpop.permute.xlu1 %1031 }
 0x42b   : > { %v1085_v39 = vadd.f32 %v1069_v34, %v3134_v41  ;;  %v1070_v42 = vmul.f32 %v2898_v40, %v1032_v38 }
 0x42c   : > { %v1034_v44 = vpop.permute.xlu0 %1033 }
 0x42d   : > { %v1071_v45 = vmul.f32 %v1034_v44, %v3007_v29  ;;  %1139 = vrot.lane.b32.xlu1 %v1084_v23, %s2909_s13  ;;  %1141 = vrot.lane.b32.xlu0 %v1085_v39, %s2909_s13  ;;  %v1086_v25 = vadd.f32 %v1070_v42, %v3144_v48 }
 0x42e   : > { %v1036_v47 = vpop.permute.xlu1 %1035 }
 0x42f   : > { %v1087_v49 = vadd.f32 %v1071_v45, %v3131_v37  ;;  %v1072_v46 = vmul.f32 %v1036_v47, %v3010_v30 }
 0x430   : > { %v1038_v50 = vpop.permute.xlu0 %1037 }
 0x431   : > { %v1073_v51 = vmul.f32 %v1038_v50, %v3013_v31  ;;  %1143 = vrot.lane.b32.xlu1 %v1086_v25, %s2909_s13  ;;  %1145 = vrot.lane.b32.xlu0 %v1087_v49, %s2909_s13  ;;  %v1088_v29 = vadd.f32 %v1072_v46, %v3138_v43 }
 0x432   : > { %v1040_v52 = vpop.permute.xlu1 %1039 }
 0x433   : > { %v1089_v53 = vadd.f32 %v1073_v51, %v3154_v63  ;;  %v1074_v54 = vmul.f32 %v1040_v52, %v3016_v32  ;;  %v2835_v32 = vld [vmem:[%s3465_s1 + $0x140] sm:$0xff]  }
 0x434   : > { %v1042_v56 = vpop.permute.xlu0 %1041  ;;  %2688 = vmatprep.subr.bf16.mxu1 %v2835_v32 }
 0x435   : > { %v1075_v58 = vmul.f32 %v1042_v56, %v3023_v35  ;;  %1147 = vrot.lane.b32.xlu1 %v1088_v29, %s2909_s13  ;;  %1149 = vrot.lane.b32.xlu0 %v1089_v53, %s2909_s13  ;;  %v1090_v31 = vadd.f32 %v1074_v54, %v3163_v8  ;;  %v2836_v35 = vld [vmem:[%s3465_s1 + $0x148] sm:$0xff]  }
 0x436   : > { %v1044_v30 = vpop.permute.xlu1 %1043  ;;  %2689 = vmatpush3.bf16.msra.mxu1 %v2835_v32  ;;  %v2842_v32 = vld [vmem:[%s3465_s1 + $0x178] sm:$0xff]  }
 0x437   : > { %v1091_v59 = vadd.f32 %v1075_v58, %v3151_v57  ;;  %v1076_v61 = vmul.f32 %v1044_v30, %v3026_v36  ;;  %2690 = vmatprep.subr.bf16.mxu1 %v2836_v35  ;;  %v2837_v36 = vld [vmem:[%s3465_s1 + $0x150] sm:$0xff]  }
 0x439   : > { %1151 = vrot.lane.b32.xlu1 %v1090_v31, %s2909_s13  ;;  %1153 = vrot.lane.b32.xlu0 %v1091_v59, %s2909_s13  ;;  %v1092_v0 = vadd.f32 %v1076_v61, %v3157_v1  ;;  %v2841_v61 = vld [vmem:[%s3465_s1 + $0x170] sm:$0xff]  }
 0x43a   : > { %2691 = vmatpush3.bf16.msra.mxu1 %v2836_v35  ;;  %v2843_v35 = vld [vmem:[%s3465_s1 + $0x180] sm:$0xff]  }
 0x43b   : > { %2692 = vmatprep.subr.bf16.mxu1 %v2837_v36  ;;  %2720 = vmatprep.subr.bf16.mxu0 %v2843_v35 }
 0x43d   : > { %1155 = vrot.lane.b32.xlu1 %v1092_v0, %s2909_s13  ;;  %v2844_v0 = vld [vmem:[%s3465_s1 + $0x188] sm:$0xff]  }
 0x43e   : > { %2693 = vmatpush3.bf16.msra.mxu1 %v2837_v36  ;;  %v2845_v36 = vld [vmem:[%s3465_s1 + $0x190] sm:$0xff]  }
 0x43f   : > { %2694 = vmatprep.subr.bf16.mxu1 %v2838_v3 }
 0x442   : > { %2695 = vmatpush3.bf16.msra.mxu1 %v2838_v3  ;;  %v2846_v3 = vld [vmem:[%s3465_s1 + $0x198] sm:$0xff]  }
 0x443   : > { %2696 = vmatprep.subr.bf16.mxu1 %v2839_v4 }
 0x446   : > { %2697 = vmatpush3.bf16.msra.mxu1 %v2839_v4  ;;  %v2847_v4 = vld [vmem:[%s3465_s1 + $0x1a0] sm:$0xff]  }
 0x447   : > { %2698 = vmatprep.subr.bf16.mxu1 %v2840_v6 }
 0x44a   : > { %2699 = vmatpush3.bf16.msra.mxu1 %v2840_v6  ;;  %v2848_v6 = vld [vmem:[%s3465_s1 + $0x1a8] sm:$0xff]  }
 0x44b   : > { %2700 = vmatprep.subr.bf16.mxu1 %v2841_v61 }
 0x44e   : > { %2701 = vmatpush3.bf16.msra.mxu1 %v2841_v61 }
 0x44f   : > { %2702 = vmatprep.subr.bf16.mxu1 %v2842_v32 }
 0x452   : > { %2703 = vmatpush3.bf16.msra.mxu1 %v2842_v32 }
 0x48f   : > { %v1126_v7 = vpop.permute.xlu0 %1125 }
 0x490   : > { %1174 = vst.msk [vmem:[#allocation2] sm:$0xff] %vm1173_vm0, %v1126_v7  ;;  %v3311_v7 = vld [vmem:[%s3466_s2 + $0x4] ss:$0 sm:$0xff] }
 0x493   : > { %v1128_v9 = vpop.permute.xlu1 %1127  ;;  %v1130_v10 = vpop.permute.xlu0 %1129 }
 0x494   : > { %1175 = vst.msk [vmem:[#allocation2 + $0x8] sm:$0xff] %vm1173_vm0, %v1128_v9  ;;  %1176 = vst.msk [vmem:[#allocation2 + $0x10] sm:$0xff] %vm1173_vm0, %v1130_v10 }
 0x497   : > { %v1132_v11 = vpop.permute.xlu1 %1131  ;;  %v1134_v12 = vpop.permute.xlu0 %1133  ;;  %v1190_v18 = vld [vmem:[#allocation2] sm:$0xff] }
 0x498   : > { %1177 = vst.msk [vmem:[#allocation2 + $0x18] sm:$0xff] %vm1173_vm0, %v1132_v11  ;;  %1178 = vst.msk [vmem:[#allocation2 + $0x20] sm:$0xff] %vm1173_vm0, %v1134_v12 }
 0x49b   : > { %v1136_v14 = vpop.permute.xlu1 %1135  ;;  %v1138_v16 = vpop.permute.xlu0 %1137  ;;  %v1191_v19 = vld [vmem:[#allocation2 + $0x8] sm:$0xff]  ;;  %v1192_v24 = vld [vmem:[#allocation2 + $0x10] sm:$0xff] }
 0x49c   : > { %1179 = vst.msk [vmem:[#allocation2 + $0x28] sm:$0xff] %vm1173_vm0, %v1136_v14  ;;  %1180 = vst.msk [vmem:[#allocation2 + $0x30] sm:$0xff] %vm1173_vm0, %v1138_v16  ;;  %v1206_v60 = vpack.c.bf16 %v1191_v19, %v1190_v18 }
 0x49e   : > { %2672 = vmatprep.mubr.bf16.mxu0 %v1206_v60 }
 0x49f   : > { %v1140_v20 = vpop.permute.xlu1 %1139  ;;  %v1142_v22 = vpop.permute.xlu0 %1141  ;;  %v1193_v26 = vld [vmem:[#allocation2 + $0x18] sm:$0xff]  ;;  %v1194_v34 = vld [vmem:[#allocation2 + $0x20] sm:$0xff] }
 0x4a0   : > { %1181 = vst.msk [vmem:[#allocation2 + $0x38] sm:$0xff] %vm1173_vm0, %v1140_v20  ;;  %1182 = vst.msk [vmem:[#allocation2 + $0x40] sm:$0xff] %vm1173_vm0, %v1142_v22  ;;  %v1207_v27 = vpack.c.bf16 %v1193_v26, %v1192_v24 }
 0x4a2   : > { %2673 = vmatmul.mubr.bf16.vlgmr.msra.gmra.mrb[32].mxu0 %v1207_v27 }
 0x4a3   : > { %v1144_v28 = vpop.permute.xlu1 %1143  ;;  %v1146_v33 = vpop.permute.xlu0 %1145  ;;  %v1195_v38 = vld [vmem:[#allocation2 + $0x28] sm:$0xff]  ;;  %v1196_v42 = vld [vmem:[#allocation2 + $0x30] sm:$0xff]  ;;  %2721 = vmatpush3.bf16.msra.mxu0 %v2843_v35 }
 0x4a4   : > { %1183 = vst.msk [vmem:[#allocation2 + $0x48] sm:$0xff] %vm1173_vm0, %v1144_v28  ;;  %1184 = vst.msk [vmem:[#allocation2 + $0x50] sm:$0xff] %vm1173_vm0, %v1146_v33  ;;  %v1208_v23 = vpack.c.bf16 %v1195_v38, %v1194_v34  ;;  %2722 = vmatprep.subr.bf16.mxu0 %v2844_v0 }
 0x4a6   : > { %2676 = vmatprep.mubr.bf16.mxu0 %v1208_v23 }
 0x4a7   : > { %v1148_v39 = vpop.permute.xlu1 %1147  ;;  %v1150_v40 = vpop.permute.xlu0 %1149  ;;  %v1197_v44 = vld [vmem:[#allocation2 + $0x38] sm:$0xff]  ;;  %v1198_v49 = vld [vmem:[#allocation2 + $0x40] sm:$0xff]  ;;  %2723 = vmatpush3.bf16.msra.mxu0 %v2844_v0 }
 0x4a8   : > { %1185 = vst.msk [vmem:[#allocation2 + $0x58] sm:$0xff] %vm1173_vm0, %v1148_v39  ;;  %1186 = vst.msk [vmem:[#allocation2 + $0x60] sm:$0xff] %vm1173_vm0, %v1150_v40  ;;  %v1209_v45 = vpack.c.bf16 %v1197_v44, %v1196_v42  ;;  %2724 = vmatprep.subr.bf16.mxu0 %v2845_v36 }
 0x4aa   : > { %2677 = vmatmul.mubr.bf16.gmra.mrb[36].mxu0 %v1209_v45 }
 0x4ab   : > { %v1152_v47 = vpop.permute.xlu1 %1151  ;;  %v1154_v25 = vpop.permute.xlu0 %1153  ;;  %v1199_v46 = vld [vmem:[#allocation2 + $0x48] sm:$0xff]  ;;  %v1200_v52 = vld [vmem:[#allocation2 + $0x50] sm:$0xff]  ;;  %2725 = vmatpush3.bf16.msra.mxu0 %v2845_v36 }
 0x4ac   : > { %1187 = vst.msk [vmem:[#allocation2 + $0x68] sm:$0xff] %vm1173_vm0, %v1152_v47  ;;  %1188 = vst.msk [vmem:[#allocation2 + $0x70] sm:$0xff] %vm1173_vm0, %v1154_v25  ;;  %v1210_v50 = vpack.c.bf16 %v1199_v46, %v1198_v49  ;;  %2726 = vmatprep.subr.bf16.mxu0 %v2846_v3 }
 0x4ae   : > { %2680 = vmatprep.mubr.bf16.mxu0 %v1210_v50 }
 0x4af   : > { %v1156_v51 = vpop.permute.xlu1 %1155  ;;  %v1201_v29 = vld [vmem:[#allocation2 + $0x58] sm:$0xff]  ;;  %v1202_v54 = vld [vmem:[#allocation2 + $0x60] sm:$0xff]  ;;  %2727 = vmatpush3.bf16.msra.mxu0 %v2846_v3 }
 0x4b0   : > { %1189 = vst.msk [vmem:[#allocation2 + $0x78] sm:$0xff] %vm1173_vm0, %v1156_v51  ;;  %v1211_v53 = vpack.c.bf16 %v1201_v29, %v1200_v52  ;;  %2728 = vmatprep.subr.bf16.mxu0 %v2847_v4 }
 0x4b2   : > { %2681 = vmatmul.mubr.bf16.gmra.mrb[40].mxu0 %v1211_v53 }
 0x4b3   : > { %v1203_v56 = vld [vmem:[#allocation2 + $0x68] sm:$0xff]  ;;  %v1204_v30 = vld [vmem:[#allocation2 + $0x70] sm:$0xff]  ;;  %2729 = vmatpush3.bf16.msra.mxu0 %v2847_v4 }
 0x4b4   : > { %v1212_v58 = vpack.c.bf16 %v1203_v56, %v1202_v54  ;;  %2730 = vmatprep.subr.bf16.mxu0 %v2848_v6 }
 0x4b6   : > { %2684 = vmatprep.mubr.bf16.mxu0 %v1212_v58 }
 0x4b7   : > { %v1205_v31 = vld [vmem:[#allocation2 + $0x78] sm:$0xff]  ;;  %2731 = vmatpush3.bf16.msra.mxu0 %v2848_v6 }
 0x4b8   : > { %v1213_v59 = vpack.c.bf16 %v1205_v31, %v1204_v30 }
 0x4ba   : > { %2685 = vmatmul.mubr.bf16.gmra.mrb[44].mxu0 %v1213_v59 }
 0x575   : > { %v2674_v9 = vpop.f32.mrb[32].mxu0 }
 0x576   : > { %v1330_v10 = vadd.f32 %v2674_v9, %v3311_v7  ;;  %v1321_v11 = vpop.f32.mrb[33].mxu0 }
 0x577   : > { %v1322_v12 = vadd.f32 %v3311_v7, %v1321_v11  ;;  %v2675_v14 = vpop.f32.mrb[34].mxu0 }
 0x578   : > { %v1402_v16 = vmul.f32 0.2, %v1330_v10  ;;  %v1333_v18 = vadd.f32 %v2675_v14, %v3311_v7  ;;  %v1324_v19 = vpop.f32.mrb[35].mxu0  ;;  %vm1386_vm1 = vcmp.gt.f32.partialorder %v1330_v10, 0.0 }
 0x579   : > { %v1400_v60 = vmul.f32 0.2, %v1322_v12  ;;  %v1325_v20 = vadd.f32 %v3311_v7, %v1324_v19  ;;  %vm1384_vm2 = vcmp.gt.f32.partialorder %v1322_v12, 0.0 }
 0x57a   : > { %vm1387_vm3 = vcmp.gt.f32.partialorder %v1333_v18, 0.0  ;;  %v1403_v22 = vmul.f32 0.2, %v1333_v18  ;;  %v1418_v26 = vsel %vm1386_vm1, %v1330_v10, %v1402_v16 }
 0x57b   : > { %vm1385_vm4 = vcmp.gt.f32.partialorder %v1325_v20, 0.0  ;;  %v1401_v24 = vmul.f32 0.2, %v1325_v20  ;;  %v1416_v34 = vsel %vm1384_vm2, %v1322_v12, %v1400_v60 }
 0x57c   : > { %v1419_v27 = vsel %vm1387_vm3, %v1333_v18, %v1403_v22 }
 0x57d   : > { %v1433_v28 = vpack.c.bf16 %v1419_v27, %v1418_v26  ;;  %v2678_v33 = vpop.f32.mrb[36].mxu0  ;;  %v1417_v38 = vsel %vm1385_vm4, %v1325_v20, %v1401_v24 }
 0x57e   : > { %v1346_v23 = vadd.f32 %v2678_v33, %v3311_v7  ;;  %v1337_v39 = vpop.f32.mrb[37].mxu0  ;;  %v1432_v40 = vpack.c.bf16 %v1417_v38, %v1416_v34 }
 0x57f   : > { %v1338_v42 = vadd.f32 %v3311_v7, %v1337_v39  ;;  %v2679_v44 = vpop.f32.mrb[38].mxu0 }
 0x580   : > { %v1406_v45 = vmul.f32 0.2, %v1346_v23  ;;  %v1349_v47 = vadd.f32 %v2679_v44, %v3311_v7  ;;  %v1340_v25 = vpop.f32.mrb[39].mxu0  ;;  %2704 = vmatprep.mubr.bf16.mxu1 %v1432_v40  ;;  %vm1390_vm5 = vcmp.gt.f32.partialorder %v1346_v23, 0.0 }
 0x581   : > { %v1404_v49 = vmul.f32 0.2, %v1338_v42  ;;  %v1341_v46 = vadd.f32 %v3311_v7, %v1340_v25  ;;  %2705 = vmatmul.mubr.bf16.vlgmr.msra.gmra.mrb[32].mxu1 %v1433_v28  ;;  %vm1388_vm6 = vcmp.gt.f32.partialorder %v1338_v42, 0.0  ;;  %v2849_v25 = vld [vmem:[%s3465_s1 + $0x1b0] sm:$0xff]  }
 0x582   : > { %vm1391_vm7 = vcmp.gt.f32.partialorder %v1349_v47, 0.0  ;;  %v1407_v50 = vmul.f32 0.2, %v1349_v47  ;;  %v1422_v52 = vsel %vm1390_vm5, %v1346_v23, %v1406_v45  ;;  %2732 = vmatprep.subr.bf16.mxu0 %v2849_v25 }
 0x583   : > { %vm1389_vm8 = vcmp.gt.f32.partialorder %v1341_v46, 0.0  ;;  %v1405_v51 = vmul.f32 0.2, %v1341_v46  ;;  %v1420_v54 = vsel %vm1388_vm6, %v1338_v42, %v1404_v49  ;;  %2733 = vmatpush3.bf16.msra.mxu0 %v2849_v25  ;;  %v2851_v49 = vld [vmem:[%s3465_s1 + $0x1c0] sm:$0xff]  }
 0x584   : > { %v1423_v29 = vsel %vm1391_vm7, %v1349_v47, %v1407_v50  ;;  %2752 = vmatprep.subr.bf16.mxu1 %v2851_v49  ;;  %v2853_v50 = vld [vmem:[%s3465_s1 + $0x1d0] sm:$0xff]  }
 0x585   : > { %v2682_v53 = vpop.f32.mrb[40].mxu0  ;;  %v1421_v56 = vsel %vm1389_vm8, %v1341_v46, %v1405_v51  ;;  %v1435_v58 = vpack.c.bf16 %v1423_v29, %v1422_v52  ;;  %v2852_v46 = vld [vmem:[%s3465_s1 + $0x1c8] sm:$0xff]   ;;  %2753 = vmatpush3.bf16.msra.mxu1 %v2851_v49  ;;  %v2854_v51 = vld [vmem:[%s3465_s1 + $0x1d8] sm:$0xff]   ;;  %v2855_v52 = vld [vmem:[%s3465_s1 + $0x1e0] sm:$0xff]  }
 0x586   : > { %v1362_v30 = vadd.f32 %v2682_v53, %v3311_v7  ;;  %v1353_v31 = vpop.f32.mrb[41].mxu0  ;;  %v1434_v59 = vpack.c.bf16 %v1421_v56, %v1420_v54  ;;  %2754 = vmatprep.subr.bf16.mxu1 %v2852_v46  ;;  %v2856_v29 = vld [vmem:[%s3465_s1 + $0x1e8] sm:$0xff]   ;;  %v3356_v53 = vld [vmem:[%s3466_s2 + $0x5] ss:$0 sm:$0xff] }
 0x587   : > { %v1354_v61 = vadd.f32 %v3311_v7, %v1353_v31  ;;  %v2683_v32 = vpop.f32.mrb[42].mxu0 }
 0x588   : > { %v1410_v35 = vmul.f32 0.2, %v1362_v30  ;;  %v1365_v0 = vadd.f32 %v2683_v32, %v3311_v7  ;;  %v1356_v36 = vpop.f32.mrb[43].mxu0  ;;  %2708 = vmatprep.mubr.bf16.mxu1 %v1434_v59  ;;  %vm1394_vm9 = vcmp.gt.f32.partialorder %v1362_v30, 0.0 }
 0x589   : > { %v1408_v3 = vmul.f32 0.2, %v1354_v61  ;;  %v1357_v4 = vadd.f32 %v3311_v7, %v1356_v36  ;;  %2709 = vmatmul.mubr.bf16.gmra.mrb[36].mxu1 %v1435_v58  ;;  %vm1392_vm10 = vcmp.gt.f32.partialorder %v1354_v61, 0.0 }
 0x58a   : > { %vm1395_vm11 = vcmp.gt.f32.partialorder %v1365_v0, 0.0  ;;  %v1411_v6 = vmul.f32 0.2, %v1365_v0  ;;  %v1426_v10 = vsel %vm1394_vm9, %v1362_v30, %v1410_v35  ;;  %2755 = vmatpush3.bf16.msra.mxu1 %v2852_v46 }
 0x58b   : > { %vm1393_vm12 = vcmp.gt.f32.partialorder %v1357_v4, 0.0  ;;  %v1409_v9 = vmul.f32 0.2, %v1357_v4  ;;  %v1424_v14 = vsel %vm1392_vm10, %v1354_v61, %v1408_v3  ;;  %2756 = vmatprep.subr.bf16.mxu1 %v2853_v50 }
 0x58c   : > { %v1427_v11 = vsel %vm1395_vm11, %v1365_v0, %v1411_v6 }
 0x58d   : > { %v2686_v12 = vpop.f32.mrb[44].mxu0  ;;  %v1425_v16 = vsel %vm1393_vm12, %v1357_v4, %v1409_v9  ;;  %v1437_v18 = vpack.c.bf16 %v1427_v11, %v1426_v10 }
 0x58e   : > { %v1378_v19 = vadd.f32 %v2686_v12, %v3311_v7  ;;  %v1369_v60 = vpop.f32.mrb[45].mxu0  ;;  %v1436_v20 = vpack.c.bf16 %v1425_v16, %v1424_v14  ;;  %2757 = vmatpush3.bf16.msra.mxu1 %v2853_v50 }
 0x58f   : > { %v1370_v22 = vadd.f32 %v3311_v7, %v1369_v60  ;;  %v2687_v24 = vpop.f32.mrb[46].mxu0  ;;  %2758 = vmatprep.subr.bf16.mxu1 %v2854_v51 }
 0x590   : > { %v1414_v26 = vmul.f32 0.2, %v1378_v19  ;;  %v1381_v27 = vadd.f32 %v2687_v24, %v3311_v7  ;;  %v1372_v28 = vpop.f32.mrb[47].mxu0  ;;  %2712 = vmatprep.mubr.bf16.mxu1 %v1436_v20  ;;  %vm1398_vm13 = vcmp.gt.f32.partialorder %v1378_v19, 0.0 }
 0x591   : > { %v1412_v33 = vmul.f32 0.2, %v1370_v22  ;;  %v1373_v34 = vadd.f32 %v3311_v7, %v1372_v28  ;;  %2713 = vmatmul.mubr.bf16.gmra.mrb[40].mxu1 %v1437_v18  ;;  %vm1396_vm14 = vcmp.gt.f32.partialorder %v1370_v22, 0.0  ;;  %v2850_v7 = vld [vmem:[%s3465_s1 + $0x1b8] sm:$0xff]  }
 0x592   : > { %vm1399_vm15 = vcmp.gt.f32.partialorder %v1381_v27, 0.0  ;;  %v1415_v38 = vmul.f32 0.2, %v1381_v27  ;;  %v1430_v39 = vsel %vm1398_vm13, %v1378_v19, %v1414_v26  ;;  %2734 = vmatprep.subr.bf16.mxu0 %v2850_v7  ;;  %2759 = vmatpush3.bf16.msra.mxu1 %v2854_v51 }
 0x593   : > { %vm1397_vm0 = vcmp.gt.f32.partialorder %v1373_v34, 0.0  ;;  %v1413_v23 = vmul.f32 0.2, %v1373_v34  ;;  %v1428_v42 = vsel %vm1396_vm14, %v1370_v22, %v1412_v33  ;;  %2735 = vmatpush3.bf16.msra.mxu0 %v2850_v7  ;;  %2760 = vmatprep.subr.bf16.mxu1 %v2855_v52 }
 0x594   : > { %v1431_v40 = vsel %vm1399_vm15, %v1381_v27, %v1415_v38 }
 0x595   : > { %v1429_v44 = vsel %vm1397_vm0, %v1373_v34, %v1413_v23  ;;  %v1439_v45 = vpack.c.bf16 %v1431_v40, %v1430_v39 }
 0x596   : > { %v1438_v47 = vpack.c.bf16 %v1429_v44, %v1428_v42  ;;  %2761 = vmatpush3.bf16.msra.mxu1 %v2855_v52 }
 0x597   : > { %2762 = vmatprep.subr.bf16.mxu1 %v2856_v29 }
 0x598   : > { %2716 = vmatprep.mubr.bf16.mxu1 %v1438_v47 }
 0x599   : > { %2717 = vmatmul.mubr.bf16.gmra.mrb[44].mxu1 %v1439_v45 }
 0x59a   : > { %2763 = vmatpush3.bf16.msra.mxu1 %v2856_v29 }
 0x654   : > { %v2706_v54 = vpop.f32.mrb[32].mxu1 }
 0x655   : > { %v1556_v56 = vadd.f32 %v2706_v54, %v3356_v53  ;;  %v1547_v58 = vpop.f32.mrb[33].mxu1 }
 0x656   : > { %v1548_v30 = vadd.f32 %v3356_v53, %v1547_v58  ;;  %v2707_v31 = vpop.f32.mrb[34].mxu1 }
 0x657   : > { %v1628_v59 = vmul.f32 0.2, %v1556_v56  ;;  %v1559_v61 = vadd.f32 %v2707_v31, %v3356_v53  ;;  %v1550_v32 = vpop.f32.mrb[35].mxu1  ;;  %vm1612_vm1 = vcmp.gt.f32.partialorder %v1556_v56, 0.0 }
 0x658   : > { %v1626_v35 = vmul.f32 0.2, %v1548_v30  ;;  %v1551_v0 = vadd.f32 %v3356_v53, %v1550_v32  ;;  %vm1610_vm2 = vcmp.gt.f32.partialorder %v1548_v30, 0.0 }
 0x659   : > { %vm1613_vm3 = vcmp.gt.f32.partialorder %v1559_v61, 0.0  ;;  %v1629_v36 = vmul.f32 0.2, %v1559_v61  ;;  %v1644_v4 = vsel %vm1612_vm1, %v1556_v56, %v1628_v59 }
 0x65a   : > { %vm1611_vm4 = vcmp.gt.f32.partialorder %v1551_v0, 0.0  ;;  %v1627_v3 = vmul.f32 0.2, %v1551_v0  ;;  %v1642_v11 = vsel %vm1610_vm2, %v1548_v30, %v1626_v35 }
 0x65b   : > { %v1645_v6 = vsel %vm1613_vm3, %v1559_v61, %v1629_v36 }
 0x65c   : > { %v1659_v9 = vpack.c.bf16 %v1645_v6, %v1644_v4  ;;  %v2710_v10 = vpop.f32.mrb[36].mxu1  ;;  %v1643_v12 = vsel %vm1611_vm4, %v1551_v0, %v1627_v3 }
 0x65d   : > { %v1572_v14 = vadd.f32 %v2710_v10, %v3356_v53  ;;  %v1563_v16 = vpop.f32.mrb[37].mxu1  ;;  %v1658_v18 = vpack.c.bf16 %v1643_v12, %v1642_v11 }
 0x65e   : > { %v1564_v19 = vadd.f32 %v3356_v53, %v1563_v16  ;;  %v2711_v60 = vpop.f32.mrb[38].mxu1 }
 0x65f   : > { %v1632_v20 = vmul.f32 0.2, %v1572_v14  ;;  %v1575_v22 = vadd.f32 %v2711_v60, %v3356_v53  ;;  %v1566_v24 = vpop.f32.mrb[39].mxu1  ;;  %2736 = vmatprep.mubr.bf16.mxu0 %v1658_v18  ;;  %vm1616_vm5 = vcmp.gt.f32.partialorder %v1572_v14, 0.0 }
 0x660   : > { %v1630_v26 = vmul.f32 0.2, %v1564_v19  ;;  %v1567_v27 = vadd.f32 %v3356_v53, %v1566_v24  ;;  %2737 = vmatmul.mubr.bf16.vlgmr.msra.gmra.mrb[48].mxu0 %v1659_v9  ;;  %vm1614_vm6 = vcmp.gt.f32.partialorder %v1564_v19, 0.0  ;;  %v2857_v24 = vld [vmem:[%s3465_s1 + $0x1f0] sm:$0xff]  }
 0x661   : > { %vm1617_vm7 = vcmp.gt.f32.partialorder %v1575_v22, 0.0  ;;  %v1633_v28 = vmul.f32 0.2, %v1575_v22  ;;  %v1648_v34 = vsel %vm1616_vm5, %v1572_v14, %v1632_v20  ;;  %2764 = vmatprep.subr.bf16.mxu1 %v2857_v24 }
 0x662   : > { %vm1615_vm8 = vcmp.gt.f32.partialorder %v1567_v27, 0.0  ;;  %v1631_v33 = vmul.f32 0.2, %v1567_v27  ;;  %v1646_v39 = vsel %vm1614_vm6, %v1564_v19, %v1630_v26  ;;  %2765 = vmatpush3.bf16.msra.mxu1 %v2857_v24  ;;  %v3383_v26 = vld [vmem:[%s3466_s2 + $0x6] ss:$0 sm:$0xff] }
 0x663   : > { %v1649_v38 = vsel %vm1617_vm7, %v1575_v22, %v1633_v28 }
 0x664   : > { %v2714_v23 = vpop.f32.mrb[40].mxu1  ;;  %v1647_v40 = vsel %vm1615_vm8, %v1567_v27, %v1631_v33  ;;  %v1661_v42 = vpack.c.bf16 %v1649_v38, %v1648_v34 }
 0x665   : > { %v1588_v44 = vadd.f32 %v2714_v23, %v3356_v53  ;;  %v1579_v45 = vpop.f32.mrb[41].mxu1  ;;  %v1660_v47 = vpack.c.bf16 %v1647_v40, %v1646_v39 }
 0x666   : > { %v1580_v25 = vadd.f32 %v3356_v53, %v1579_v45  ;;  %v2715_v7 = vpop.f32.mrb[42].mxu1 }
 0x667   : > { %v1636_v49 = vmul.f32 0.2, %v1588_v44  ;;  %v1591_v46 = vadd.f32 %v2715_v7, %v3356_v53  ;;  %v1582_v50 = vpop.f32.mrb[43].mxu1  ;;  %2740 = vmatprep.mubr.bf16.mxu0 %v1660_v47  ;;  %vm1620_vm9 = vcmp.gt.f32.partialorder %v1588_v44, 0.0 }
 0x668   : > { %v1634_v51 = vmul.f32 0.2, %v1580_v25  ;;  %v1583_v52 = vadd.f32 %v3356_v53, %v1582_v50  ;;  %2741 = vmatmul.mubr.bf16.gmra.mrb[52].mxu0 %v1661_v42  ;;  %vm1618_vm10 = vcmp.gt.f32.partialorder %v1580_v25, 0.0 }
 0x669   : > { %vm1621_vm11 = vcmp.gt.f32.partialorder %v1591_v46, 0.0  ;;  %v1637_v29 = vmul.f32 0.2, %v1591_v46  ;;  %v1652_v56 = vsel %vm1620_vm9, %v1588_v44, %v1636_v49 }
 0x66a   : > { %vm1619_vm12 = vcmp.gt.f32.partialorder %v1583_v52, 0.0  ;;  %v1635_v54 = vmul.f32 0.2, %v1583_v52  ;;  %v1650_v31 = vsel %vm1618_vm10, %v1580_v25, %v1634_v51 }
 0x66b   : > { %v1653_v58 = vsel %vm1621_vm11, %v1591_v46, %v1637_v29 }
 0x66c   : > { %v2718_v30 = vpop.f32.mrb[44].mxu1  ;;  %v1651_v59 = vsel %vm1619_vm12, %v1583_v52, %v1635_v54  ;;  %v1663_v61 = vpack.c.bf16 %v1653_v58, %v1652_v56 }
 0x66d   : > { %v1604_v32 = vadd.f32 %v2718_v30, %v3356_v53  ;;  %v1595_v35 = vpop.f32.mrb[45].mxu1  ;;  %v1662_v0 = vpack.c.bf16 %v1651_v59, %v1650_v31 }
 0x66e   : > { %v1596_v36 = vadd.f32 %v3356_v53, %v1595_v35  ;;  %v2719_v3 = vpop.f32.mrb[46].mxu1 }
 0x66f   : > { %v1640_v4 = vmul.f32 0.2, %v1604_v32  ;;  %v1607_v6 = vadd.f32 %v2719_v3, %v3356_v53  ;;  %v1598_v9 = vpop.f32.mrb[47].mxu1  ;;  %2744 = vmatprep.mubr.bf16.mxu0 %v1662_v0  ;;  %vm1624_vm13 = vcmp.gt.f32.partialorder %v1604_v32, 0.0 }
 0x670   : > { %v1638_v10 = vmul.f32 0.2, %v1596_v36  ;;  %v1599_v11 = vadd.f32 %v3356_v53, %v1598_v9  ;;  %2745 = vmatmul.mubr.bf16.gmra.mrb[56].mxu0 %v1663_v61  ;;  %vm1622_vm14 = vcmp.gt.f32.partialorder %v1596_v36, 0.0  ;;  %v2858_v53 = vld [vmem:[%s3465_s1 + $0x1f8] sm:$0xff]  }
 0x671   : > { %vm1625_vm15 = vcmp.gt.f32.partialorder %v1607_v6, 0.0  ;;  %v1641_v12 = vmul.f32 0.2, %v1607_v6  ;;  %v1656_v16 = vsel %vm1624_vm13, %v1604_v32, %v1640_v4  ;;  %2766 = vmatprep.subr.bf16.mxu1 %v2858_v53 }
 0x672   : > { %vm1623_vm0 = vcmp.gt.f32.partialorder %v1599_v11, 0.0  ;;  %v1639_v14 = vmul.f32 0.2, %v1599_v11  ;;  %v1654_v19 = vsel %vm1622_vm14, %v1596_v36, %v1638_v10  ;;  %2767 = vmatpush3.bf16.msra.mxu1 %v2858_v53 }
 0x673   : > { %v1657_v18 = vsel %vm1625_vm15, %v1607_v6, %v1641_v12 }
 0x674   : > { %v1655_v60 = vsel %vm1623_vm0, %v1599_v11, %v1639_v14  ;;  %v1665_v20 = vpack.c.bf16 %v1657_v18, %v1656_v16 }
 0x675   : > { %v1664_v22 = vpack.c.bf16 %v1655_v60, %v1654_v19 }
 0x677   : > { %2748 = vmatprep.mubr.bf16.mxu0 %v1664_v22 }
 0x678   : > { %2749 = vmatmul.mubr.bf16.gmra.mrb[60].mxu0 %v1665_v20 }
 0x733   : > { %v2738_v27 = vpop.f32.mrb[48].mxu0 }
 0x734   : > { %v1782_v28 = vadd.f32 %v2738_v27, %v3383_v26  ;;  %v1773_v33 = vpop.f32.mrb[49].mxu0 }
 0x735   : > { %v1774_v34 = vadd.f32 %v3383_v26, %v1773_v33  ;;  %v2739_v38 = vpop.f32.mrb[50].mxu0 }
 0x736   : > { %v1854_v23 = vmul.f32 0.2, %v1782_v28  ;;  %v1785_v39 = vadd.f32 %v2739_v38, %v3383_v26  ;;  %v1776_v40 = vpop.f32.mrb[51].mxu0  ;;  %vm1838_vm1 = vcmp.gt.f32.partialorder %v1782_v28, 0.0 }
 0x737   : > { %v1852_v42 = vmul.f32 0.2, %v1774_v34  ;;  %v1777_v44 = vadd.f32 %v3383_v26, %v1776_v40  ;;  %vm1836_vm2 = vcmp.gt.f32.partialorder %v1774_v34, 0.0 }
 0x738   : > { %vm1839_vm3 = vcmp.gt.f32.partialorder %v1785_v39, 0.0  ;;  %v1855_v45 = vmul.f32 0.2, %v1785_v39  ;;  %v1870_v25 = vsel %vm1838_vm1, %v1782_v28, %v1854_v23 }
 0x739   : > { %vm1837_vm4 = vcmp.gt.f32.partialorder %v1777_v44, 0.0  ;;  %v1853_v47 = vmul.f32 0.2, %v1777_v44  ;;  %v1868_v50 = vsel %vm1836_vm2, %v1774_v34, %v1852_v42 }
 0x73a   : > { %v1871_v7 = vsel %vm1839_vm3, %v1785_v39, %v1855_v45 }
 0x73b   : > { %v1885_v49 = vpack.c.bf16 %v1871_v7, %v1870_v25  ;;  %v2742_v46 = vpop.f32.mrb[52].mxu0  ;;  %v1869_v51 = vsel %vm1837_vm4, %v1777_v44, %v1853_v47 }
 0x73c   : > { %v1798_v52 = vadd.f32 %v2742_v46, %v3383_v26  ;;  %v1789_v29 = vpop.f32.mrb[53].mxu0  ;;  %v1884_v54 = vpack.c.bf16 %v1869_v51, %v1868_v50 }
 0x73d   : > { %v1790_v56 = vadd.f32 %v3383_v26, %v1789_v29  ;;  %v2743_v58 = vpop.f32.mrb[54].mxu0 }
 0x73e   : > { %v1858_v30 = vmul.f32 0.2, %v1798_v52  ;;  %v1801_v31 = vadd.f32 %v2743_v58, %v3383_v26  ;;  %v1792_v59 = vpop.f32.mrb[55].mxu0  ;;  %2768 = vmatprep.mubr.bf16.mxu1 %v1884_v54  ;;  %vm1842_vm5 = vcmp.gt.f32.partialorder %v1798_v52, 0.0 }
 0x73f   : > { %v1856_v61 = vmul.f32 0.2, %v1790_v56  ;;  %v1793_v32 = vadd.f32 %v3383_v26, %v1792_v59  ;;  %2769 = vmatmul.mubr.bf16.vlgmr.msra.gmra.mrb[48].mxu1 %v1885_v49  ;;  %vm1840_vm6 = vcmp.gt.f32.partialorder %v1790_v56, 0.0  ;;  %v3404_v59 = vld [vmem:[%s3466_s2 + $0x7] ss:$0 sm:$0xff] }
 0x740   : > { %vm1843_vm7 = vcmp.gt.f32.partialorder %v1801_v31, 0.0  ;;  %v1859_v35 = vmul.f32 0.2, %v1801_v31  ;;  %v1874_v36 = vsel %vm1842_vm5, %v1798_v52, %v1858_v30 }
 0x741   : > { %vm1841_vm8 = vcmp.gt.f32.partialorder %v1793_v32, 0.0  ;;  %v1857_v0 = vmul.f32 0.2, %v1793_v32  ;;  %v1872_v6 = vsel %vm1840_vm6, %v1790_v56, %v1856_v61 }
 0x742   : > { %v1875_v3 = vsel %vm1843_vm7, %v1801_v31, %v1859_v35 }
 0x743   : > { %v2746_v4 = vpop.f32.mrb[56].mxu0  ;;  %v1873_v9 = vsel %vm1841_vm8, %v1793_v32, %v1857_v0  ;;  %v1887_v10 = vpack.c.bf16 %v1875_v3, %v1874_v36 }
 0x744   : > { %v1814_v11 = vadd.f32 %v2746_v4, %v3383_v26  ;;  %v1805_v12 = vpop.f32.mrb[57].mxu0  ;;  %v1886_v14 = vpack.c.bf16 %v1873_v9, %v1872_v6 }
 0x745   : > { %v1806_v16 = vadd.f32 %v3383_v26, %v1805_v12  ;;  %v2747_v18 = vpop.f32.mrb[58].mxu0 }
 0x746   : > { %v1862_v19 = vmul.f32 0.2, %v1814_v11  ;;  %v1817_v60 = vadd.f32 %v2747_v18, %v3383_v26  ;;  %v1808_v20 = vpop.f32.mrb[59].mxu0  ;;  %2772 = vmatprep.mubr.bf16.mxu1 %v1886_v14  ;;  %vm1846_vm9 = vcmp.gt.f32.partialorder %v1814_v11, 0.0 }
 0x747   : > { %v1860_v22 = vmul.f32 0.2, %v1806_v16  ;;  %v1809_v24 = vadd.f32 %v3383_v26, %v1808_v20  ;;  %2773 = vmatmul.mubr.bf16.gmra.mrb[52].mxu1 %v1887_v10  ;;  %vm1844_vm10 = vcmp.gt.f32.partialorder %v1806_v16, 0.0 }
 0x748   : > { %vm1847_vm11 = vcmp.gt.f32.partialorder %v1817_v60, 0.0  ;;  %v1863_v53 = vmul.f32 0.2, %v1817_v60  ;;  %v1878_v28 = vsel %vm1846_vm9, %v1814_v11, %v1862_v19 }
 0x749   : > { %vm1845_vm12 = vcmp.gt.f32.partialorder %v1809_v24, 0.0  ;;  %v1861_v27 = vmul.f32 0.2, %v1809_v24  ;;  %v1876_v38 = vsel %vm1844_vm10, %v1806_v16, %v1860_v22 }
 0x74a   : > { %v1879_v33 = vsel %vm1847_vm11, %v1817_v60, %v1863_v53 }
 0x74b   : > { %v2750_v34 = vpop.f32.mrb[60].mxu0  ;;  %v1877_v23 = vsel %vm1845_vm12, %v1809_v24, %v1861_v27  ;;  %v1889_v39 = vpack.c.bf16 %v1879_v33, %v1878_v28 }
 0x74c   : > { %v1830_v40 = vadd.f32 %v2750_v34, %v3383_v26  ;;  %v1821_v42 = vpop.f32.mrb[61].mxu0  ;;  %v1888_v44 = vpack.c.bf16 %v1877_v23, %v1876_v38 }
 0x74d   : > { %v1822_v45 = vadd.f32 %v3383_v26, %v1821_v42  ;;  %v2751_v47 = vpop.f32.mrb[62].mxu0 }
 0x74e   : > { %v1866_v25 = vmul.f32 0.2, %v1830_v40  ;;  %v1833_v7 = vadd.f32 %v2751_v47, %v3383_v26  ;;  %v1824_v49 = vpop.f32.mrb[63].mxu0  ;;  %2776 = vmatprep.mubr.bf16.mxu1 %v1888_v44  ;;  %vm1850_vm13 = vcmp.gt.f32.partialorder %v1830_v40, 0.0 }
 0x74f   : > { %v1864_v46 = vmul.f32 0.2, %v1822_v45  ;;  %v1825_v50 = vadd.f32 %v3383_v26, %v1824_v49  ;;  %2777 = vmatmul.mubr.bf16.gmra.mrb[56].mxu1 %v1889_v39  ;;  %vm1848_vm14 = vcmp.gt.f32.partialorder %v1822_v45, 0.0 }
 0x750   : > { %vm1851_vm15 = vcmp.gt.f32.partialorder %v1833_v7, 0.0  ;;  %v1867_v51 = vmul.f32 0.2, %v1833_v7  ;;  %v1882_v29 = vsel %vm1850_vm13, %v1830_v40, %v1866_v25 }
 0x751   : > { %vm1849_vm0 = vcmp.gt.f32.partialorder %v1825_v50, 0.0  ;;  %v1865_v52 = vmul.f32 0.2, %v1825_v50  ;;  %v1880_v56 = vsel %vm1848_vm14, %v1822_v45, %v1864_v46 }
 0x752   : > { %v1883_v54 = vsel %vm1851_vm15, %v1833_v7, %v1867_v51 }
 0x753   : > { %v1881_v58 = vsel %vm1849_vm0, %v1825_v50, %v1865_v52  ;;  %v1891_v30 = vpack.c.bf16 %v1883_v54, %v1882_v29 }
 0x754   : > { %v1890_v31 = vpack.c.bf16 %v1881_v58, %v1880_v56 }
 0x756   : > { %2780 = vmatprep.mubr.bf16.mxu1 %v1890_v31 }
 0x757   : > { %2781 = vmatmul.mubr.bf16.gmra.mrb[60].mxu1 %v1891_v30 }
 0x812   : > { %v2770_v26 = vpop.f32.mrb[48].mxu1 }
 0x813   : > { %v2008_v61 = vadd.f32 %v2770_v26, %v3404_v59  ;;  %v1999_v32 = vpop.f32.mrb[49].mxu1 }
 0x814   : > { %v2000_v35 = vadd.f32 %v3404_v59, %v1999_v32  ;;  %v2771_v0 = vpop.f32.mrb[50].mxu1 }
 0x815   : > { %vm2064_vm1 = vcmp.gt.f32.partialorder %v2008_v61, 0.0  ;;  %v2080_v36 = vmul.f32 0.2, %v2008_v61  ;;  %v2011_v3 = vadd.f32 %v2771_v0, %v3404_v59  ;;  %v2002_v4 = vpop.f32.mrb[51].mxu1 }
 0x816   : > { %vm2062_vm2 = vcmp.gt.f32.partialorder %v2000_v35, 0.0  ;;  %v2078_v6 = vmul.f32 0.2, %v2000_v35  ;;  %v2003_v9 = vadd.f32 %v3404_v59, %v2002_v4 }
 0x817   : > { %v2096_v10 = vsel %vm2064_vm1, %v2008_v61, %v2080_v36  ;;  %vm2065_vm3 = vcmp.gt.f32.partialorder %v2011_v3, 0.0  ;;  %v2081_v11 = vmul.f32 0.2, %v2011_v3 }
 0x818   : > { %v2112_v12 = vadd.f32 %v2096_v10, %v3099_v62  ;;  %v2094_v14 = vsel %vm2062_vm2, %v2000_v35, %v2078_v6  ;;  %vm2063_vm4 = vcmp.gt.f32.partialorder %v2003_v9, 0.0  ;;  %v2079_v16 = vmul.f32 0.2, %v2003_v9 }
 0x819   : > { %v2110_v18 = vadd.f32 %v2094_v14, %v3102_v55  ;;  %v2097_v19 = vsel %vm2065_vm3, %v2011_v3, %v2081_v11 }
 0x81a   : > { %2128 = vst [vmem:[%s3415_s26 + $0x10] sm:$0xff] %v2112_v12  ;;  %v2113_v60 = vadd.f32 %v2097_v19, %v3106_v2  ;;  %v2095_v20 = vsel %vm2063_vm4, %v2003_v9, %v2079_v16  ;;  %v2774_v22 = vpop.f32.mrb[52].mxu1 }
 0x81b   : > { %2126 = vst [vmem:[%s3415_s26] sm:$0xff] %v2110_v18  ;;  %v2111_v24 = vadd.f32 %v2095_v20, %v3110_v5  ;;  %v2024_v53 = vadd.f32 %v2774_v22, %v3404_v59  ;;  %v2015_v27 = vpop.f32.mrb[53].mxu1 }
 0x81c   : > { %2129 = vst [vmem:[%s3415_s26 + $0x18] sm:$0xff] %v2113_v60  ;;  %v2016_v62 = vadd.f32 %v3404_v59, %v2015_v27  ;;  %v2775_v28 = vpop.f32.mrb[54].mxu1 }
 0x81d   : > { %2127 = vst [vmem:[%s3415_s26 + $0x8] sm:$0xff] %v2111_v24  ;;  %vm2068_vm5 = vcmp.gt.f32.partialorder %v2024_v53, 0.0  ;;  %v2084_v55 = vmul.f32 0.2, %v2024_v53  ;;  %v2027_v33 = vadd.f32 %v2775_v28, %v3404_v59  ;;  %v2018_v34 = vpop.f32.mrb[55].mxu1 }
 0x81e   : > { %vm2066_vm6 = vcmp.gt.f32.partialorder %v2016_v62, 0.0  ;;  %v2082_v2 = vmul.f32 0.2, %v2016_v62  ;;  %v2019_v38 = vadd.f32 %v3404_v59, %v2018_v34 }
 0x81f   : > { %v2100_v5 = vsel %vm2068_vm5, %v2024_v53, %v2084_v55  ;;  %vm2069_vm7 = vcmp.gt.f32.partialorder %v2027_v33, 0.0  ;;  %v2085_v23 = vmul.f32 0.2, %v2027_v33 }
 0x820   : > { %v2116_v39 = vadd.f32 %v2100_v5, %v3115_v13  ;;  %v2098_v40 = vsel %vm2066_vm6, %v2016_v62, %v2082_v2  ;;  %vm2067_vm8 = vcmp.gt.f32.partialorder %v2019_v38, 0.0  ;;  %v2083_v42 = vmul.f32 0.2, %v2019_v38 }
 0x821   : > { %v2114_v44 = vadd.f32 %v2098_v40, %v3118_v15  ;;  %v2101_v45 = vsel %vm2069_vm7, %v2027_v33, %v2085_v23 }
 0x822   : > { %2132 = vst [vmem:[%s3415_s26 + $0x30] sm:$0xff] %v2116_v39  ;;  %v2117_v47 = vadd.f32 %v2101_v45, %v3121_v17  ;;  %v2099_v25 = vsel %vm2067_vm8, %v2019_v38, %v2083_v42  ;;  %v2778_v7 = vpop.f32.mrb[56].mxu1 }
 0x823   : > { %2130 = vst [vmem:[%s3415_s26 + $0x20] sm:$0xff] %v2114_v44  ;;  %v2115_v49 = vadd.f32 %v2099_v25, %v3126_v21  ;;  %v2040_v46 = vadd.f32 %v2778_v7, %v3404_v59  ;;  %v2031_v50 = vpop.f32.mrb[57].mxu1 }
 0x824   : > { %2133 = vst [vmem:[%s3415_s26 + $0x38] sm:$0xff] %v2117_v47  ;;  %v2032_v13 = vadd.f32 %v3404_v59, %v2031_v50  ;;  %v2779_v51 = vpop.f32.mrb[58].mxu1 }
 0x825   : > { %2131 = vst [vmem:[%s3415_s26 + $0x28] sm:$0xff] %v2115_v49  ;;  %vm2072_vm9 = vcmp.gt.f32.partialorder %v2040_v46, 0.0  ;;  %v2088_v15 = vmul.f32 0.2, %v2040_v46  ;;  %v2043_v52 = vadd.f32 %v2779_v51, %v3404_v59  ;;  %v2034_v29 = vpop.f32.mrb[59].mxu1 }
 0x826   : > { %vm2070_vm10 = vcmp.gt.f32.partialorder %v2032_v13, 0.0  ;;  %v2086_v17 = vmul.f32 0.2, %v2032_v13  ;;  %v2035_v54 = vadd.f32 %v3404_v59, %v2034_v29 }
 0x827   : > { %v2104_v21 = vsel %vm2072_vm9, %v2040_v46, %v2088_v15  ;;  %vm2073_vm11 = vcmp.gt.f32.partialorder %v2043_v52, 0.0  ;;  %v2089_v56 = vmul.f32 0.2, %v2043_v52 }
 0x828   : > { %v2120_v58 = vadd.f32 %v2104_v21, %v3131_v37  ;;  %v2102_v30 = vsel %vm2070_vm10, %v2032_v13, %v2086_v17  ;;  %vm2071_vm12 = vcmp.gt.f32.partialorder %v2035_v54, 0.0  ;;  %v2087_v31 = vmul.f32 0.2, %v2035_v54 }
 0x829   : > { %v2118_v26 = vadd.f32 %v2102_v30, %v3134_v41  ;;  %v2105_v61 = vsel %vm2073_vm11, %v2043_v52, %v2089_v56 }
 0x82a   : > { %2136 = vst [vmem:[%s3415_s26 + $0x50] sm:$0xff] %v2120_v58  ;;  %v2121_v32 = vadd.f32 %v2105_v61, %v3138_v43  ;;  %v2103_v35 = vsel %vm2071_vm12, %v2035_v54, %v2087_v31  ;;  %v2782_v0 = vpop.f32.mrb[60].mxu1 }
 0x82b   : > { %2134 = vst [vmem:[%s3415_s26 + $0x40] sm:$0xff] %v2118_v26  ;;  %v2119_v36 = vadd.f32 %v2103_v35, %v3144_v48  ;;  %v2056_v3 = vadd.f32 %v2782_v0, %v3404_v59  ;;  %v2047_v4 = vpop.f32.mrb[61].mxu1 }
 0x82c   : > { %2137 = vst [vmem:[%s3415_s26 + $0x58] sm:$0xff] %v2121_v32  ;;  %v2048_v37 = vadd.f32 %v3404_v59, %v2047_v4  ;;  %v2783_v6 = vpop.f32.mrb[62].mxu1 }
 0x82d   : > { %2135 = vst [vmem:[%s3415_s26 + $0x48] sm:$0xff] %v2119_v36  ;;  %vm2076_vm13 = vcmp.gt.f32.partialorder %v2056_v3, 0.0  ;;  %v2092_v41 = vmul.f32 0.2, %v2056_v3  ;;  %v2059_v9 = vadd.f32 %v2783_v6, %v3404_v59  ;;  %v2050_v10 = vpop.f32.mrb[63].mxu1 }
 0x82e   : > { %vm2074_vm14 = vcmp.gt.f32.partialorder %v2048_v37, 0.0  ;;  %v2090_v43 = vmul.f32 0.2, %v2048_v37  ;;  %v2051_v48 = vadd.f32 %v3404_v59, %v2050_v10 }
 0x82f   : > { %v2108_v11 = vsel %vm2076_vm13, %v2056_v3, %v2092_v41  ;;  %vm2077_vm15 = vcmp.gt.f32.partialorder %v2059_v9, 0.0  ;;  %v2093_v12 = vmul.f32 0.2, %v2059_v9 }
 0x830   : > { %v2124_v14 = vadd.f32 %v2108_v11, %v3151_v57  ;;  %v2106_v16 = vsel %vm2074_vm14, %v2048_v37, %v2090_v43  ;;  %vm2075_vm0 = vcmp.gt.f32.partialorder %v2051_v48, 0.0  ;;  %v2091_v18 = vmul.f32 0.2, %v2051_v48 }
 0x831   : > { %v2122_v19 = vadd.f32 %v2106_v16, %v3154_v63  ;;  %v2109_v60 = vsel %vm2077_vm15, %v2059_v9, %v2093_v12 }
 0x832   : > { %2140 = vst [vmem:[%s3415_s26 + $0x70] sm:$0xff] %v2124_v14  ;;  %v2125_v20 = vadd.f32 %v2109_v60, %v3157_v1  ;;  %v2107_v22 = vsel %vm2075_vm0, %v2051_v48, %v2091_v18 }
 0x833   : > { %2138 = vst [vmem:[%s3415_s26 + $0x60] sm:$0xff] %v2122_v19  ;;  %v2123_v24 = vadd.f32 %v2107_v22, %v3163_v8 }
 0x834   : > { %2141 = vst [vmem:[%s3415_s26 + $0x78] sm:$0xff] %v2125_v20 }
 0x835   : > { %2139 = vst [vmem:[%s3415_s26 + $0x68] sm:$0xff] %v2123_v24 }
 0x836 PF: > { %s13_s12 = sadd.s32 1, %s2905_s12  }
 0x837   : > { %p10_p4 = scmp.ge.s32.totalorder %s13_s12, 5  }
 0x839   :  { %12 = sbr.rel (!%p10_p4) target bundleno = 1 (0x1), region = 76 }

</bundles_post_ra>
